<compile_context>
chip_gen: v7x
topology: tpu7x:2x2x1
jax: 0.10.0
libtpu: 0.0.40
codegen_flags: <defaults>
</compile_context>

<pallas_src>
import functools

import jax
import jax.numpy as jnp
from jax.experimental import pallas as pl
from jax.experimental.pallas import tpu as pltpu


# ----------------------------------------------------------------------------
# Pallas kernel: one graph block per grid step.
#   2x (GCNConv + ReLU)  ->  per-graph segment max pool  ->  speed encoder ->
#   linear1 + ReLU (split matmul on [pooled | v])  ->  linear2 logits.
# ----------------------------------------------------------------------------
def gcn_policy_kernel(
    speed_ref,   # SMEM (G,)   f32   scalar-prefetched per-graph speed
    x_ref,       # (NB, F)     bf16  node features for this block
    a_ref,       # (NB, NB)    bf16  diagonal block of normalized adjacency
    w1_ref,      # (F, H)      bf16
    w2_ref,      # (H, H)      bf16
    wl1_ref,     # (H+S, L1)   f32
    wl2_ref,     # (L1, Ap)    f32   action dim padded to Ap lanes
    small_ref,   # (8, Ap)     f32   rows: b1, b2, bs, bl1, bl2, ws
    out_ref,     # (GBp, Ap)   f32
    *, graphs_per_block, nodes_per_graph,
):
    f32 = jnp.float32
    bf16 = jnp.bfloat16
    H = w1_ref.shape[1]
    S = wl1_ref.shape[0] - H
    L1 = wl1_ref.shape[1]
    GB = graphs_per_block
    npg = nodes_per_graph
    GBp = out_ref.shape[0]

    # Packed small params (all slices start at lane 0).
    b1 = small_ref[0:1, 0:H]
    b2 = small_ref[1:2, 0:H]
    bs = small_ref[2:3, 0:S]
    bl1 = small_ref[3:4, 0:L1]
    bl2 = small_ref[4:5, :]
    ws = small_ref[5:6, 0:S]

    x = x_ref[...]                     # (NB, F)  bf16
    a = a_ref[...]                     # (NB, NB) bf16

    # GCNConv1 + ReLU:  relu(A_hat @ (x @ W1) + b1)   (bf16 MXU, f32 acc)
    t = jnp.dot(x, w1_ref[...], preferred_element_type=f32)
    h = jnp.dot(a, t.astype(bf16), preferred_element_type=f32) + b1
    h = jnp.maximum(h, 0.0)

    # GCNConv2 + ReLU:  relu(A_hat @ (h @ W2) + b2)
    t = jnp.dot(h.astype(bf16), w2_ref[...], preferred_element_type=f32)
    h = jnp.dot(a, t.astype(bf16), preferred_element_type=f32) + b2
    h = jnp.maximum(h, 0.0)            # (NB, H) f32

    # Per-graph max pooling as a contiguous segment max (graphs are
    # equal-sized and contiguous within the block): one sublane reduce per
    # graph over its own npg rows; pooled lives in vregs (no VMEM scratch).
    pooled = jnp.concatenate(
        [jnp.max(h[g * npg:(g + 1) * npg, :], axis=0, keepdims=True)
         for g in range(GB)],
        axis=0)                        # (GB, H)

    # Speed encoder Linear(1 -> S): SMEM scalar broadcast multiply (VPU).
    blk = pl.program_id(0)
    v = jnp.concatenate(
        [speed_ref[blk * GB + g] * ws + bs for g in range(GB)],
        axis=0)                        # (GB, S)

    # Pad graph rows up to the sublane-aligned output height so the final
    # store is a full unmasked block store (pad rows are sliced off outside).
    pad = GBp - GB
    if pad:
        pooled = jnp.concatenate([pooled, jnp.zeros((pad, H), f32)], axis=0)
        v = jnp.concatenate([v, jnp.zeros((pad, S), f32)], axis=0)

    # linear1 on cat([pooled, v]) expressed as split matmul over wl1 slices.
    h1 = (jnp.dot(pooled, wl1_ref[0:H, :], preferred_element_type=f32)
          + jnp.dot(v, wl1_ref[H:H + S, :], preferred_element_type=f32)
          + bl1)
    h1 = jnp.maximum(h1, 0.0)          # (GBp, L1)

    # linear2 -> logits, lane-dense (GBp, Ap) store.
    out_ref[...] = jnp.dot(h1, wl2_ref[...], preferred_element_type=f32) + bl2


def _vmem_limit_bytes(frac=0.75, fallback=48 * 1024 * 1024):
    """Raise the scoped-VMEM cap so large resident A blocks don't spill."""
    try:
        info = pltpu.get_tpu_info()
        cap = getattr(info, "vmem_capacity_bytes", None)
        if cap:
            return int(cap * frac)
    except Exception:
        pass
    return fallback


# ----------------------------------------------------------------------------
# Wrapper: block the batched graph, pack params, call the kernel, unpad.
# ----------------------------------------------------------------------------
def gcn_policy_forward(x, a_hat, mask, speed, params, *, num_blocks=1,
                       validate=True):
    """x:(N,F) f32, a_hat:(N,N) f32, mask:(G,N) {0,1} f32, speed:(G,1) f32."""
    (w1, b1, w2, b2, ws, bs, wl1, bl1, wl2, bl2) = params
    N, F = x.shape
    G = mask.shape[0]
    H = w1.shape[1]
    S = ws.shape[1]
    L1 = wl1.shape[1]
    A = wl2.shape[1]

    B = num_blocks
    assert N % B == 0 and G % B == 0, "graphs/nodes must split evenly into blocks"
    NB = N // B
    GB = G // B
    assert NB % GB == 0, "equal-sized graphs required"
    npg = NB // GB
    assert NB % 8 == 0, "node block must be sublane-aligned"
    assert B == 1 or NB % 128 == 0, \
        "diagonal A block last dim must be a 128 multiple (or use num_blocks=1)"

    GBp = max(8, ((GB + 7) // 8) * 8)   # graphs per block, sublane-padded
    Ap = max(128, ((A + 127) // 128) * 128)  # lane-dense padded action dim

    f32 = jnp.float32
    bf16 = jnp.bfloat16

    if validate:
        # Fail loudly if the contiguous / equal-sized-graph assumption or the
        # block-diagonal-adjacency assumption is violated (review concern).
        exp_batch = jnp.repeat(jnp.arange(G), npg)
        exp_mask = (exp_batch[None, :] == jnp.arange(G)[:, None]).astype(mask.dtype)
        assert bool(jnp.all(mask == exp_mask)), \
            "graphs must be contiguous and equal-sized"
        blk_ids = jnp.repeat(jnp.arange(B), NB)
        same_blk = blk_ids[:, None] == blk_ids[None, :]
        assert bool(jnp.all(jnp.where(same_blk, 0.0, a_hat) == 0.0)), \
            "a_hat has cross-block edges; blocking would drop them"

    # ---- cast inputs once; diagonal A blocks are extracted by the BlockSpec ----
    x_b = x.astype(bf16)                               # (N, F)
    a_b = a_hat.astype(bf16)                           # (N, N)
    speed_flat = speed.reshape(-1).astype(f32)         # (G,)  -> SMEM prefetch

    # ---- pack parameters ----
    wl2_p = jnp.pad(wl2, ((0, 0), (0, Ap - A))).astype(f32)   # (L1, Ap)
    small = jnp.zeros((8, Ap), f32)
    small = small.at[0, :H].set(b1.reshape(-1))
    small = small.at[1, :H].set(b2.reshape(-1))
    small = small.at[2, :S].set(bs.reshape(-1))
    small = small.at[3, :L1].set(bl1.reshape(-1))
    small = small.at[4, :A].set(bl2.reshape(-1))
    small = small.at[5, :S].set(ws.reshape(-1))

    kernel = functools.partial(gcn_policy_kernel,
                               graphs_per_block=GB, nodes_per_graph=npg)

    out = pl.pallas_call(
        kernel,
        out_shape=jax.ShapeDtypeStruct((B * GBp, Ap), f32),
        grid_spec=pltpu.PrefetchScalarGridSpec(
            num_scalar_prefetch=1,           # speed table -> SMEM
            grid=(B,),
            in_specs=[
                pl.BlockSpec((NB, F), lambda b, s: (b, 0)),
                pl.BlockSpec((NB, NB), lambda b, s: (b, b)),   # diagonal A block
                pl.BlockSpec((F, H), lambda b, s: (0, 0)),
                pl.BlockSpec((H, H), lambda b, s: (0, 0)),
                pl.BlockSpec((H + S, L1), lambda b, s: (0, 0)),
                pl.BlockSpec((L1, Ap), lambda b, s: (0, 0)),
                pl.BlockSpec((8, Ap), lambda b, s: (0, 0)),
            ],
            out_specs=pl.BlockSpec((GBp, Ap), lambda b, s: (b, 0)),
        ),
        compiler_params=pltpu.CompilerParams(
            dimension_semantics=("parallel",),
            vmem_limit_bytes=_vmem_limit_bytes()),
    )(speed_flat, x_b, a_b,
      w1.astype(bf16), w2.astype(bf16), wl1.astype(f32), wl2_p, small)

    logits = out.reshape(B, GBp, Ap)[:, :GB, :A].reshape(G, A)
    # matches `h.squeeze()` in the reference module
    return jnp.squeeze(logits)


# ----------------------------------------------------------------------------
# Glue: dense GCN-normalized adjacency (self loops + D^-1/2 A D^-1/2)
# ----------------------------------------------------------------------------
def build_a_hat(edge_index, edge_weight, num_nodes):
    src, dst = edge_index[0], edge_index[1]
    loop = jnp.arange(num_nodes, dtype=src.dtype)
    src = jnp.concatenate([src, loop])
    dst = jnp.concatenate([dst, loop])
    w = jnp.concatenate([edge_weight, jnp.ones((num_nodes,), jnp.float32)])
    deg = jnp.zeros((num_nodes,), jnp.float32).at[dst].add(w)
    dinv = jnp.where(deg > 0, 1.0 / jnp.sqrt(deg), 0.0)
    norm = dinv[src] * w * dinv[dst]
    a_hat = jnp.zeros((num_nodes, num_nodes), jnp.float32).at[dst, src].add(norm)
    return a_hat


def make_params(key, n_features, hidden, speed_dim, n_actions, l1=16):
    ks = jax.random.split(key, 7)

    def init(k, shape):
        return (jax.random.normal(k, shape, jnp.float32) * 0.1).astype(jnp.float32)

    w1 = init(ks[0], (n_features, hidden))
    b1 = jnp.zeros((1, hidden), jnp.float32)
    w2 = init(ks[1], (hidden, hidden))
    b2 = jnp.zeros((1, hidden), jnp.float32)
    ws = init(ks[2], (1, speed_dim))
    bs = init(ks[3], (1, speed_dim))
    wl1 = init(ks[4], (hidden + speed_dim, l1))
    bl1 = jnp.zeros((1, l1), jnp.float32)
    wl2 = init(ks[5], (l1, n_actions))
    bl2 = init(ks[6], (1, n_actions))
    return (w1, b1, w2, b2, ws, bs, wl1, bl1, wl2, bl2)


def reference_forward(x, a_hat, mask, speed, params):
    """Pure-JAX f32 reference of the PyTorch module (dense form)."""
    (w1, b1, w2, b2, ws, bs, wl1, bl1, wl2, bl2) = params
    h = jnp.maximum(a_hat @ (x @ w1) + b1, 0.0)
    h = jnp.maximum(a_hat @ (h @ w2) + b2, 0.0)
    pooled = jnp.max(jnp.where(mask[:, :, None] > 0.5, h[None, :, :], -1e30), axis=1)
    v = speed @ ws + bs
    h1 = jnp.maximum(jnp.concatenate([pooled, v], axis=1) @ wl1 + bl1, 0.0)
    return jnp.squeeze(h1 @ wl2 + bl2)


if __name__ == "__main__":
    key = jax.random.PRNGKey(0)

    # 4 graphs x 128 nodes, processed as 2 parallel blocks of 2 graphs each
    # (NB=256 keeps the diagonal A block shape (256, 256) tiling-friendly).
    N_FEATURES, HIDDEN, SPEED_DIM, N_ACTIONS = 4, 16, 4, 3
    NODES_PER_GRAPH, N_GRAPHS, NUM_BLOCKS = 128, 4, 2
    N = NODES_PER_GRAPH * N_GRAPHS

    k_x, k_w, k_p, k_s = jax.random.split(key, 4)
    x = jax.random.normal(k_x, (N, N_FEATURES), jnp.float32)

    # Ring edges within each graph (both directions), deterministic.
    srcs, dsts = [], []
    for g in range(N_GRAPHS):
        off = g * NODES_PER_GRAPH
        for i in range(NODES_PER_GRAPH):
            j = (i + 1) % NODES_PER_GRAPH
            srcs += [off + i, off + j]
            dsts += [off + j, off + i]
    edge_index = jnp.array([srcs, dsts], dtype=jnp.int32)
    edge_weight = jax.random.uniform(k_w, (edge_index.shape[1],), jnp.float32,
                                     minval=0.5, maxval=1.5)

    # batch vector -> membership mask (G, N)
    batch_vec = jnp.repeat(jnp.arange(N_GRAPHS, dtype=jnp.int32), NODES_PER_GRAPH)
    mask = (batch_vec[None, :] == jnp.arange(N_GRAPHS, dtype=jnp.int32)[:, None])
    mask = mask.astype(jnp.float32)

    speed = jax.random.uniform(k_s, (N_GRAPHS, 1), jnp.float32)

    a_hat = build_a_hat(edge_index, edge_weight, N)
    params = make_params(k_p, N_FEATURES, HIDDEN, SPEED_DIM, N_ACTIONS)

    out = gcn_policy_forward(x, a_hat, mask, speed, params, num_blocks=NUM_BLOCKS)
    jax.block_until_ready(out)
    assert out.shape == (N_GRAPHS, N_ACTIONS)

    ref = reference_forward(x, a_hat, mask, speed, params)
    assert jnp.allclose(out, ref, rtol=5e-2, atol=5e-2), (out, ref)

    print("KERNEL_OK")
</pallas_src>

<mosaic_0001>
module attributes {stable_mosaic.version = 11 : i64} {
  func.func @gcn_policy_kernel(%arg0: i32, %arg1: memref<4xf32, #tpu.memory_space<smem>>, %arg2: memref<256x4xbf16, #tpu.memory_space<vmem>>, %arg3: memref<256x256xbf16, #tpu.memory_space<vmem>>, %arg4: memref<4x16xbf16, #tpu.memory_space<vmem>>, %arg5: memref<16x16xbf16, #tpu.memory_space<vmem>>, %arg6: memref<20x16xf32, #tpu.memory_space<vmem>>, %arg7: memref<16x128xf32, #tpu.memory_space<vmem>>, %arg8: memref<8x128xf32, #tpu.memory_space<vmem>>, %arg9: memref<8x128xf32, #tpu.memory_space<vmem>>) attributes {dimension_semantics = [#tpu.dimension_semantics<parallel>], iteration_bounds = array<i64: 2>, scalar_prefetch = 1 : i64, scratch_operands = 0 : i64, tpu.core_type = #tpu.core_type<tc>, window_params = [{transform_indices = @transform_0, window_bounds = array<i64: 256, 4>}, {transform_indices = @transform_1, window_bounds = array<i64: 256, 256>}, {pipeline_mode = #tpu.pipeline_mode<synchronous>, transform_indices = @transform_2, window_bounds = array<i64: 4, 16>}, {pipeline_mode = #tpu.pipeline_mode<synchronous>, transform_indices = @transform_3, window_bounds = array<i64: 16, 16>}, {pipeline_mode = #tpu.pipeline_mode<synchronous>, transform_indices = @transform_4, window_bounds = array<i64: 20, 16>}, {pipeline_mode = #tpu.pipeline_mode<synchronous>, transform_indices = @transform_5, window_bounds = array<i64: 16, 128>}, {pipeline_mode = #tpu.pipeline_mode<synchronous>, transform_indices = @transform_6, window_bounds = array<i64: 8, 128>}, {transform_indices = @transform_7, window_bounds = array<i64: 8, 128>}]} {
    %c0 = arith.constant 0 : index
    %c0_0 = arith.constant 0 : index
    %0 = vector.load %arg8[%c0, %c0_0] : memref<8x128xf32, #tpu.memory_space<vmem>>, vector<1x16xf32>
    %c1 = arith.constant 1 : index
    %c0_1 = arith.constant 0 : index
    %1 = vector.load %arg8[%c1, %c0_1] : memref<8x128xf32, #tpu.memory_space<vmem>>, vector<1x16xf32>
    %c2 = arith.constant 2 : index
    %c0_2 = arith.constant 0 : index
    %2 = vector.load %arg8[%c2, %c0_2] : memref<8x128xf32, #tpu.memory_space<vmem>>, vector<1x4xf32>
    %c3 = arith.constant 3 : index
    %c0_3 = arith.constant 0 : index
    %3 = vector.load %arg8[%c3, %c0_3] : memref<8x128xf32, #tpu.memory_space<vmem>>, vector<1x16xf32>
    %c4 = arith.constant 4 : index
    %c0_4 = arith.constant 0 : index
    %4 = vector.load %arg8[%c4, %c0_4] : memref<8x128xf32, #tpu.memory_space<vmem>>, vector<1x128xf32>
    %c5 = arith.constant 5 : index
    %c0_5 = arith.constant 0 : index
    %5 = vector.load %arg8[%c5, %c0_5] : memref<8x128xf32, #tpu.memory_space<vmem>>, vector<1x4xf32>
    %c0_6 = arith.constant 0 : index
    %c0_7 = arith.constant 0 : index
    %6 = vector.load %arg2[%c0_6, %c0_7] : memref<256x4xbf16, #tpu.memory_space<vmem>>, vector<256x4xbf16>
    %c0_8 = arith.constant 0 : index
    %c0_9 = arith.constant 0 : index
    %7 = vector.load %arg3[%c0_8, %c0_9] : memref<256x256xbf16, #tpu.memory_space<vmem>>, vector<256x256xbf16>
    %c0_10 = arith.constant 0 : index
    %c0_11 = arith.constant 0 : index
    %8 = vector.load %arg4[%c0_10, %c0_11] : memref<4x16xbf16, #tpu.memory_space<vmem>>, vector<4x16xbf16>
    %cst = arith.constant dense<0.000000e+00> : vector<256x16xf32>
    %9 = tpu.matmul %6, %8, %cst {dimension_numbers = #tpu.dot_dimension_numbers<[1], [0], [0], [1], [0, 0, 1, 1], [], []>} : vector<256x4xbf16>, vector<4x16xbf16>, vector<256x16xf32> -> vector<256x16xf32>
    %10 = arith.truncf %9 : vector<256x16xf32> to vector<256x16xbf16>
    %cst_12 = arith.constant dense<0.000000e+00> : vector<256x16xf32>
    %11 = tpu.matmul %7, %10, %cst_12 {dimension_numbers = #tpu.dot_dimension_numbers<[1], [0], [0], [1], [0, 0, 1, 1], [], []>} : vector<256x256xbf16>, vector<256x16xbf16>, vector<256x16xf32> -> vector<256x16xf32>
    %12 = vector.broadcast %0 : vector<1x16xf32> to vector<256x16xf32>
    %13 = arith.addf %11, %12 : vector<256x16xf32>
    %cst_13 = arith.constant 0.000000e+00 : f32
    %14 = vector.broadcast %cst_13 : f32 to vector<256x16xf32>
    %15 = arith.maximumf %13, %14 : vector<256x16xf32>
    %16 = arith.truncf %15 : vector<256x16xf32> to vector<256x16xbf16>
    %c0_14 = arith.constant 0 : index
    %c0_15 = arith.constant 0 : index
    %17 = vector.load %arg5[%c0_14, %c0_15] : memref<16x16xbf16, #tpu.memory_space<vmem>>, vector<16x16xbf16>
    %cst_16 = arith.constant dense<0.000000e+00> : vector<256x16xf32>
    %18 = tpu.matmul %16, %17, %cst_16 {dimension_numbers = #tpu.dot_dimension_numbers<[1], [0], [0], [1], [0, 0, 1, 1], [], []>} : vector<256x16xbf16>, vector<16x16xbf16>, vector<256x16xf32> -> vector<256x16xf32>
    %19 = arith.truncf %18 : vector<256x16xf32> to vector<256x16xbf16>
    %cst_17 = arith.constant dense<0.000000e+00> : vector<256x16xf32>
    %20 = tpu.matmul %7, %19, %cst_17 {dimension_numbers = #tpu.dot_dimension_numbers<[1], [0], [0], [1], [0, 0, 1, 1], [], []>} : vector<256x256xbf16>, vector<256x16xbf16>, vector<256x16xf32> -> vector<256x16xf32>
    %21 = vector.broadcast %1 : vector<1x16xf32> to vector<256x16xf32>
    %22 = arith.addf %20, %21 : vector<256x16xf32>
    %cst_18 = arith.constant 0.000000e+00 : f32
    %23 = vector.broadcast %cst_18 : f32 to vector<256x16xf32>
    %24 = arith.maximumf %22, %23 : vector<256x16xf32>
    %25 = vector.extract_strided_slice %24 {offsets = [0, 0], sizes = [128, 16], strides = [1, 1]} : vector<256x16xf32> to vector<128x16xf32>
    %cst_19 = arith.constant dense<0xFF800000> : vector<16xf32>
    %26 = vector.multi_reduction <maximumf>, %25, %cst_19 [0] : vector<128x16xf32> to vector<16xf32>
    %27 = vector.shape_cast %26 : vector<16xf32> to vector<1x16xf32>
    %28 = vector.extract_strided_slice %24 {offsets = [128, 0], sizes = [128, 16], strides = [1, 1]} : vector<256x16xf32> to vector<128x16xf32>
    %cst_20 = arith.constant dense<0xFF800000> : vector<16xf32>
    %29 = vector.multi_reduction <maximumf>, %28, %cst_20 [0] : vector<128x16xf32> to vector<16xf32>
    %30 = vector.shape_cast %29 : vector<16xf32> to vector<1x16xf32>
    %31 = tpu.concatenate %27, %30 in 0 : vector<1x16xf32>, vector<1x16xf32> -> vector<2x16xf32>
    %c2_i32 = arith.constant 2 : i32
    %32 = arith.muli %arg0, %c2_i32 : i32
    %c0_i32 = arith.constant 0 : i32
    %33 = arith.addi %32, %c0_i32 : i32
    %34 = arith.index_cast %33 : i32 to index
    %35 = memref.load %arg1[%34] : memref<4xf32, #tpu.memory_space<smem>>
    %36 = vector.broadcast %35 : f32 to vector<1x4xf32>
    %37 = arith.mulf %36, %5 : vector<1x4xf32>
    %38 = arith.addf %37, %2 : vector<1x4xf32>
    %c2_i32_21 = arith.constant 2 : i32
    %39 = arith.muli %arg0, %c2_i32_21 : i32
    %c1_i32 = arith.constant 1 : i32
    %40 = arith.addi %39, %c1_i32 : i32
    %41 = arith.index_cast %40 : i32 to index
    %42 = memref.load %arg1[%41] : memref<4xf32, #tpu.memory_space<smem>>
    %43 = vector.broadcast %42 : f32 to vector<1x4xf32>
    %44 = arith.mulf %43, %5 : vector<1x4xf32>
    %45 = arith.addf %44, %2 : vector<1x4xf32>
    %46 = tpu.concatenate %38, %45 in 0 : vector<1x4xf32>, vector<1x4xf32> -> vector<2x4xf32>
    %cst_22 = arith.constant 0.000000e+00 : f32
    %47 = vector.broadcast %cst_22 : f32 to vector<6x16xf32>
    %48 = tpu.concatenate %31, %47 in 0 : vector<2x16xf32>, vector<6x16xf32> -> vector<8x16xf32>
    %cst_23 = arith.constant 0.000000e+00 : f32
    %49 = vector.broadcast %cst_23 : f32 to vector<6x4xf32>
    %50 = tpu.concatenate %46, %49 in 0 : vector<2x4xf32>, vector<6x4xf32> -> vector<8x4xf32>
    %c0_24 = arith.constant 0 : index
    %c0_25 = arith.constant 0 : index
    %51 = vector.load %arg6[%c0_24, %c0_25] : memref<20x16xf32, #tpu.memory_space<vmem>>, vector<16x16xf32>
    %cst_26 = arith.constant dense<0.000000e+00> : vector<8x16xf32>
    %52 = tpu.matmul %48, %51, %cst_26 {dimension_numbers = #tpu.dot_dimension_numbers<[1], [0], [0], [1], [0, 0, 1, 1], [], []>} : vector<8x16xf32>, vector<16x16xf32>, vector<8x16xf32> -> vector<8x16xf32>
    %c16 = arith.constant 16 : index
    %c0_27 = arith.constant 0 : index
    %53 = vector.load %arg6[%c16, %c0_27] : memref<20x16xf32, #tpu.memory_space<vmem>>, vector<4x16xf32>
    %cst_28 = arith.constant dense<0.000000e+00> : vector<8x16xf32>
    %54 = tpu.matmul %50, %53, %cst_28 {dimension_numbers = #tpu.dot_dimension_numbers<[1], [0], [0], [1], [0, 0, 1, 1], [], []>} : vector<8x4xf32>, vector<4x16xf32>, vector<8x16xf32> -> vector<8x16xf32>
    %55 = arith.addf %52, %54 : vector<8x16xf32>
    %56 = vector.broadcast %3 : vector<1x16xf32> to vector<8x16xf32>
    %57 = arith.addf %55, %56 : vector<8x16xf32>
    %cst_29 = arith.constant 0.000000e+00 : f32
    %58 = vector.broadcast %cst_29 : f32 to vector<8x16xf32>
    %59 = arith.maximumf %57, %58 : vector<8x16xf32>
    %c0_30 = arith.constant 0 : index
    %c0_31 = arith.constant 0 : index
    %60 = vector.load %arg7[%c0_30, %c0_31] : memref<16x128xf32, #tpu.memory_space<vmem>>, vector<16x128xf32>
    %cst_32 = arith.constant dense<0.000000e+00> : vector<8x128xf32>
    %61 = tpu.matmul %59, %60, %cst_32 {dimension_numbers = #tpu.dot_dimension_numbers<[1], [0], [0], [1], [0, 0, 1, 1], [], []>} : vector<8x16xf32>, vector<16x128xf32>, vector<8x128xf32> -> vector<8x128xf32>
    %62 = vector.broadcast %4 : vector<1x128xf32> to vector<8x128xf32>
    %63 = arith.addf %61, %62 : vector<8x128xf32>
    %c0_33 = arith.constant 0 : index
    %c0_34 = arith.constant 0 : index
    %64 = vector.load %arg9[%c0_33, %c0_34] : memref<8x128xf32, #tpu.memory_space<vmem>>, vector<8x128xf32>
    tpu.vector_store %arg9[%c0_33, %c0_34], %63 {strides = array<i32>} : memref<8x128xf32, #tpu.memory_space<vmem>>, vector<8x128xf32>,
    return
  }
  func.func @transform_0(%arg0: i32, %arg1: memref<4xf32, #tpu.memory_space<smem>>) -> (i32, i32) {
    %c0_i32 = arith.constant 0 : i32
    %c0_i32_0 = arith.constant 0 : i32
    return %arg0, %c0_i32 : i32, i32
  }
  func.func @transform_1(%arg0: i32, %arg1: memref<4xf32, #tpu.memory_space<smem>>) -> (i32, i32) {
    %c0_i32 = arith.constant 0 : i32
    return %arg0, %arg0 : i32, i32
  }
  func.func @transform_2(%arg0: i32, %arg1: memref<4xf32, #tpu.memory_space<smem>>) -> (i32, i32) {
    %c0_i32 = arith.constant 0 : i32
    %c0_i32_0 = arith.constant 0 : i32
    %c0_i32_1 = arith.constant 0 : i32
    return %c0_i32, %c0_i32_0 : i32, i32
  }
  func.func @transform_3(%arg0: i32, %arg1: memref<4xf32, #tpu.memory_space<smem>>) -> (i32, i32) {
    %c0_i32 = arith.constant 0 : i32
    %c0_i32_0 = arith.constant 0 : i32
    %c0_i32_1 = arith.constant 0 : i32
    return %c0_i32, %c0_i32_0 : i32, i32
  }
  func.func @transform_4(%arg0: i32, %arg1: memref<4xf32, #tpu.memory_space<smem>>) -> (i32, i32) {
    %c0_i32 = arith.constant 0 : i32
    %c0_i32_0 = arith.constant 0 : i32
    %c0_i32_1 = arith.constant 0 : i32
    return %c0_i32, %c0_i32_0 : i32, i32
  }
  func.func @transform_5(%arg0: i32, %arg1: memref<4xf32, #tpu.memory_space<smem>>) -> (i32, i32) {
    %c0_i32 = arith.constant 0 : i32
    %c0_i32_0 = arith.constant 0 : i32
    %c0_i32_1 = arith.constant 0 : i32
    return %c0_i32, %c0_i32_0 : i32, i32
  }
  func.func @transform_6(%arg0: i32, %arg1: memref<4xf32, #tpu.memory_space<smem>>) -> (i32, i32) {
    %c0_i32 = arith.constant 0 : i32
    %c0_i32_0 = arith.constant 0 : i32
    %c0_i32_1 = arith.constant 0 : i32
    return %c0_i32, %c0_i32_0 : i32, i32
  }
  func.func @transform_7(%arg0: i32, %arg1: memref<4xf32, #tpu.memory_space<smem>>) -> (i32, i32) {
    %c0_i32 = arith.constant 0 : i32
    %c0_i32_0 = arith.constant 0 : i32
    return %arg0, %c0_i32 : i32, i32
  }
}

</mosaic_0001>

<bundles_post_ra>
// kernel: tpu_custom_call.1
= control target key start
LH: loop header
LB: loop body
LE: loop exit
PB: predicated region body
PF: predicated region fallthrough
CT: control target
= control target key end

     0   :  { %s3320_s0 = inlined_call_operand.vmem [shape: f32[4], index: 0, kind: input, shape index: {}]   ;;  %s3321_s1 = inlined_call_operand.vmem [shape: bf16[512,4], index: 1, kind: input, shape index: {}]   ;;  %s3322_s2 = inlined_call_operand.hbm [shape: bf16[512,512], index: 2, kind: input, shape index: {}]   ;;  %s3323_s3 = inlined_call_operand.vmem [shape: bf16[4,16], index: 3, kind: input, shape index: {}]   ;;  %s3324_s4 = inlined_call_operand.vmem [shape: bf16[16,16], index: 4, kind: input, shape index: {}]   ;;  %s3325_s5 = inlined_call_operand.vmem [shape: f32[20,16], index: 5, kind: input, shape index: {}]   ;;  %s3326_s6 = inlined_call_operand.vmem [shape: f32[16,128], index: 6, kind: input, shape index: {}]   ;;  %s3327_s7 = inlined_call_operand.vmem [shape: f32[8,128], index: 7, kind: input, shape index: {}]   ;;  %s3328_s8 = inlined_call_operand.hbm [shape: f32[16,128], index: 8, kind: output, shape index: {}]  }
   0x1   :  { %s13_s29 = sshll.u32 %s3320_s0, 4  ;;  %s14_s29 = int_to_ptr.vmem [resolvable:$true] %s13_s29 }
   0x2   :  { %s2562_s30 = scalar_lea.vmem %s14_s29, 16  ;;  %p2567_p1 = scmp.lt.s32.totalorder %s14_s29, %s14_s29 }
   0x3   :  { %p2563_p0 = scmp.ne.s32.totalorder %s14_s29, %s2562_s30  ;;  %p2568_p2 = scmp.lt.s32.totalorder %s2562_s30, %s2562_s30 }
   0x5   :  { %p2569_p3 = por %p2568_p2, %p2567_p1 }
   0x7   :  { %p2570_p4 = pnand %p2569_p3, %p2563_p0 }
   0x9   :  { %2573 = shalt.err (!%p2570_p4)  }
   0xa   :  { %s2698_s9 = smov [#allocation3]  }
   0xb   :  { %16 = dma.vmem_to_smem %s14_s29, 16, %s2698_s9, [#allocation2] }
   0xc   :  { %2660 = dma.done.wait [#allocation2], 16 }
   0xd   :  { %2661 = vsyncadd [#allocation2], 4294967280 }
   0xe   :  { %18 = sfence }
   0xf   :  { %19 = vsyncpa [#allocation5], 0 }
  0x10   :  { %21 = vsyncpa [#allocation5 + $0x1], 0 }
  0x11   :  { %22 = vsyncpa [#allocation6], 0 }
  0x12   :  { %24 = vsyncpa [#allocation6 + $0x1], 0  ;;  %s2755_s10 = smov 0   ;;  %s2757_s0 = smov 0  }
  0x13   :  { %s2759_s11 = smov 0   ;;  %s2761_s12 = smov 0  }
  0x14   :  { %s2763_s13 = smov 0   ;;  %s2765_s14 = smov 0  }
  0x15   :  { %s2767_s15 = smov 0  }
  0x16 LB: > { %3331 = sst [smem:[#allocation11_spill]] %s2692_s14  ;;  %s2789_s16 = sadd.s32 4294967295, %s2696_s15   ;;  %s2696_s15 = sphi %s2767_s15, %s3351_s15   ;;  %s2692_s14 = sphi %s2765_s14, %s3345_s14   ;;  %s2688_s13 = sphi %s2763_s13, %s3350_s13   ;;  %s2684_s12 = sphi %s2761_s12, %s3349_s12   ;;  %s2680_s11 = sphi %s2759_s11, %s3348_s11   ;;  %s2676_s0 = sphi %s2757_s0, %s3347_s0   ;;  %s2672_s10 = sphi %s2755_s10, %s3346_s10  }
  0x17   : > { %s1949_s17 = sadd.s32 4294967294, %s2696_s15   ;;  %s2793_s18 = sadd.s32 1, %s2696_s15  }
  0x18   : > { %s65_s19 = sadd.s32 1, %s2692_s14  ;;  %s60_s20 = ssub.s32 %s2696_s15, %s2793_s18 }
  0x19   : > { %p72_p5 = scmp.ne.s32.totalorder %s2692_s14, %s2688_s13  ;;  %s62_s21 = sor.u32 %s60_s20, %s60_s20 }
  0x1a   : > { %p73_p6 = scmp.eq.s32.totalorder %s2696_s15, 0  ;;  %p63_p7 = scmp.eq.s32.totalorder %s62_s21, 0 }
  0x1b   : > { %p78_p8 = scmp.ne.s32.totalorder %s2688_s13, %s2684_s12  ;;  %p79_p10 = scmp.eq.s32.totalorder %s2789_s16, 0 }
  0x1c   : > { %p2802_p9 = por %p73_p6, %p72_p5  ;;  %p194_p12 = scmp.eq.s32.totalorder %s60_s20, 0 }
  0x1d   : > { %s2808_s23 = scalar_select %p63_p7, %s2692_s14, %s65_s19  }
  0x1e   : > { %p2810_p11 = por %p79_p10, %p78_p8  ;;  %s196_s25 = sadd.s32 1, %s2680_s11 }
  0x1f   : > { %3333 = sst [smem:[#allocation12_spill]] %s2808_s23  ;;  %p206_p13 = scmp.ne.s32.totalorder %s2680_s11, %s2676_s0 }
  0x20   : > { %s2818_s26 = scalar_select %p194_p12, %s2680_s11, %s196_s25  }
  0x21   : > { %p207_p0 = scmp.eq.s32.totalorder %s2789_s16, 1  ;;  %p212_p1 = scmp.ne.s32.totalorder %s2676_s0, %s2672_s10 }
  0x22   : > { %3335 = sst [smem:[#allocation13_spill]] %s2818_s26  ;;  %p213_p2 = scmp.eq.s32.totalorder %s1949_s17, 1 }
  0x23   : > { %p2824_p4 = por %p207_p0, %p206_p13  ;;  %p2432_p5 = scmp.lt.s32.totalorder %s2696_s15, 2 }
  0x24   : > { %p2829_p6 = por %p213_p2, %p212_p1  ;;  %s257_s29 = sand.u32 1, %s2692_s14  }
  0x25   : > { %s3336_s27 = scalar_select %p2824_p4, 1, 0 }
  0x26   : > { %s3337_s28 = scalar_select %p2829_p6, 1, 0 }
  0x27   : > { %s1952_s30 = sshll.u32 %s257_s29, 8  ;;  %s1954_s9 = sshll.u32 %s2696_s15, 1 }
  0x28   : > { %s2056_s12 = sshll.u32 %s2696_s15, 7  ;;  %s261_s19 = scalar_lea.vmem [#allocation4], %s1952_s30 }
  0x29   : > { %s271_s20 = sshll.u32 %s261_s19, 4  ;;  %s268_s21 = sadd.s32 %s2056_s12, %s1954_s9  ;;  %s2836_s20 = int_to_ptr.vmem [resolvable:$true] %s271_s20 }
  0x2a   : > { %s1956_s17 = sshll.u32 %s268_s21, 6  ;;  %p2840_p7 = pnand %p2432_p5, %p2802_p9 }
  0x2b   : > { %s2847_s14 = scalar_lea.hbm %s3322_s2, %s1956_s17  ;;  %s2850_s30 = scalar_lea.sflag [#allocation5], %s257_s29 }
  0x2c   : > { %s2574_s9 = scalar_lea.hbm %s2847_s14, 4096  ;;  %p2576_p9 = pneg %p2840_p7 }
  0x2d   : > { %p2575_p10 = scmp.ne.s32.totalorder %s2847_s14, %s2574_s9  ;;  %s2579_s26 = scalar_lea.hbm %s3322_s2, 16384 }
  0x2e   : > { %p2580_p0 = scmp.lt.u32.totalorder %s2847_s14, %s3322_s2  ;;  %p2581_p1 = scmp.lt.u32.totalorder %s2579_s26, %s2574_s9 }
  0x2f   : > { %p2577_p12 = pnand %p2576_p9, %p2575_p10  ;;  %p2583_p5 = scmp.lt.u32.totalorder %s2574_s9, %s2847_s14 }
  0x30   : > { %p2582_p2 = por %p2581_p1, %p2580_p0 }
  0x31   : > { %p2578_p13 = pneg %p2577_p12 }
  0x32   : > { %p2584_p3 = por %p2583_p5, %p2582_p2 }
  0x34   : > { %p2585_p8 = pnand %p2584_p3, %p2578_p13 }
  0x36   : > { %2588 = shalt.err (!%p2585_p8)
}
  0x37   : > { %s2589_s29 = scalar_lea.vmem %s2836_s20, 4096  ;;  %s2699_s21 = smov [#allocation4]  }
  0x38   : > { %p2590_p10 = scmp.ne.s32.totalorder %s2836_s20, %s2589_s29  ;;  %s2594_s17 = sshll.u32 %s2699_s21, 4  ;;  %s2595_s17 = int_to_ptr.vmem [resolvable:$false] %s2594_s17 }
  0x39   : > { %s2596_s22 = scalar_lea.vmem %s2595_s17, 8192  ;;  %p2597_p4 = scmp.lt.s32.totalorder %s2836_s20, %s2595_s17 }
  0x3a   : > { %p2592_p12 = pnand %p2590_p10, %p2576_p9  ;;  %p2598_p0 = scmp.lt.s32.totalorder %s2596_s22, %s2589_s29 }
  0x3c   : > { %p2593_p6 = pneg %p2592_p12  ;;  %p2599_p1 = por %p2598_p0, %p2597_p4 }
  0x3e   : > { %p2600_p2 = pnand %p2599_p1, %p2593_p6 }
  0x40   : > { %2603 = shalt.err (!%p2600_p2)
}
  0x41   : > { %s2700_s9 = smov 256   ;;  %s2701_s23 = smov 128  }
  0x42   : > { %s2702_s26 = smov 8   ;;  %p279_p3 = scmp.lt.s32.totalorder %s2696_s15, 3 }
  0x43   : > { %2427 = dma.hbm_to_vmem [thread:$0]  (!%p2840_p7), %s2847_s14, 4096, %s2836_s20, %s2850_s30, %s2700_s9, %s2701_s23, %s2702_s26  }
  0x44   : > { %p3339_p8 = scmp.ge.s32.totalorder %s2696_s15, 1 }
  0x46   : > { %p280_p9 = pnand %p3339_p8, %p279_p3 }
  0x47   : > { %s285_s12 = sand.u32 (!%p280_p9), 1, %s2688_s13  }
  0x48   : > { %283 = sbr.rel (%p280_p9) target bundleno = 1737 (0x6c9), region = 48  ;;  %s1958_s19 = sshll.u32 (!%p280_p9), %s285_s12, 8 }
  0x49   : > { %s286_s29 = scalar_lea.sflag (!%p280_p9), [#allocation5], %s285_s12  ;;  %s2882_s21 = scalar_lea.vmem (!%p280_p9), [#allocation4], %s1958_s19 }
  0x4f   : > { %2663 = dma.done.wait (%p2810_p11), %s286_s29, 4096  }
  0x50   : > { %2665 = vsyncadd (%p2810_p11), %s286_s29, 4294963200  ;;  %s1960_s17 = sshll.u32 %s2789_s16, 5  ;;  %vm534_vm0 = vcmask 1041408   ;;  %vm485_vm1 = vcmask 31744   ;;  %v404_v0 = vld [vmem:[%s3323_s3] sm:$0x3] }
  0x51   : > { %p326_p4 = scmp.lt.s32.totalorder %s1960_s17, 63  ;;  %2419 = vmatprep.subr.msk.bf16.mxu1 %vm534_vm0, %v404_v0  ;;  %v536_v1 = vsel %vm534_vm0, %v404_v0, 0  ;;  %2418 = vmatprep.subr.msk.bf16.mxu0 %vm534_vm0, %v404_v0  ;;  %v2933_v18 = vld [vmem:[%s2882_s21 + $0x4] ss:$8 sps:$4 sm:$0xff]   ;;  %vm1096_vm2 = vcmask 130048   ;;  %vm1617_vm3 = vcmask 1043456  }
  0x52   : > { %2417 = vmatpush3.bf16.msra.mxu1 %v536_v1  ;;  %2324 = vmatpush3.bf16.msra.mxu0 %v536_v1  ;;  %vm1593_vm4 = vcmask 1040384   ;;  %vm2704_vm5 = vmmov 0   ;;  %s322_s24 = sand.u32 1, %s2676_s0   ;;  %s2053_s26 = sshll.u32 %s2789_s16, 7 }
  0x53   : > { %s3353_s17 = smov (!%p326_p4, %s1960_s17), 63  ;;  %s1959_s22 = sshll.u32 %s322_s24, 3 }
  0x54   : > { %s1961_s14 = sshll.u32 %s3353_s17, 2  ;;  %s324_s12 = scalar_lea.vmem [#allocation7], %s1959_s22 }
  0x55   : > { %s2892_s30 = scalar_lea.vmem %s3321_s1, %s1961_s14  ;;  %s1864_s19 = sshll.u32 %s324_s12, 4  ;;  %s3270_s19 = int_to_ptr.vmem [resolvable:$true] %s1864_s19 }
  0x56   : > { %v2497_v2 = vld [vmem:[%s2892_s30 + $0x10] sm:$0xff]   ;;  %v2498_v3 = vld [vmem:[%s2892_s30 + $0x18] sm:$0xff]   ;;  %v2499_v4 = vld [vmem:[%s2892_s30 + $0x20] sm:$0xff]   ;;  %p3340_p6 = scmp.ne.s32.totalorder %s3336_s27, 0 }
  0x57   : > { %2329 = vmatprep.mubr.msk.bf16.mxu1 %vm485_vm1, %v2497_v2  ;;  %v2503_v5 = vld [vmem:[%s2892_s30] sm:$0xff]   ;;  %v2504_v6 = vld [vmem:[%s2892_s30 + $0x8] sm:$0xff]   ;;  %v2501_v8 = vld [vmem:[%s2892_s30 + $0x30] sm:$0xff]  }
  0x58   : > { %2330 = vmatmul.mubr.msk.bf16.vlgmr.msra.gmra.mrb[0].mxu1 %vm485_vm1, %v2498_v3  ;;  %v2500_v7 = vld [vmem:[%s2892_s30 + $0x28] sm:$0xff]   ;;  %2325 = vmatprep.mubr.msk.bf16.mxu0 %vm485_vm1, %v2503_v5  ;;  %v2502_v9 = vld [vmem:[%s2892_s30 + $0x38] sm:$0xff]   ;;  %v2505_v10 = vld [vmem:[%s2892_s30 + $0x40] sm:$0xff]  }
  0x59   : > { %2333 = vmatprep.mubr.msk.bf16.mxu1 %vm485_vm1, %v2499_v4  ;;  %2326 = vmatmul.mubr.msk.bf16.vlgmr.msra.gmra.mrb[0].mxu0 %vm485_vm1, %v2504_v6  ;;  %v2506_v11 = vld [vmem:[%s2892_s30 + $0x48] sm:$0xff]   ;;  %v2507_v12 = vld [vmem:[%s2892_s30 + $0x50] sm:$0xff]   ;;  %v2508_v13 = vld [vmem:[%s2892_s30 + $0x58] sm:$0xff]  }
  0x5a   : > { %v2509_v14 = vld [vmem:[%s2892_s30 + $0x60] sm:$0xff]   ;;  %v2510_v15 = vld [vmem:[%s2892_s30 + $0x68] sm:$0xff]   ;;  %v2511_v16 = vld [vmem:[%s2892_s30 + $0x70] sm:$0xff]  }
  0x5b   : > { %v2512_v17 = vld [vmem:[%s2892_s30 + $0x78] sm:$0xff]   ;;  %v2937_v3 = vld [vmem:[%s2882_s21] ss:$8 sps:$4 sm:$0xff]   ;;  %v2948_v6 = vld [vmem:[%s2882_s21 + $0x24] ss:$8 sps:$4 sm:$0xff]  }
  0x5c   : > { %v2940_v4 = vld [vmem:[%s2882_s21 + $0x14] ss:$8 sps:$4 sm:$0xff]   ;;  %v2945_v5 = vld [vmem:[%s2882_s21 + $0x10] ss:$8 sps:$4 sm:$0xff]  }
  0x60   : > { %2334 = vmatmul.mubr.msk.bf16.gmra.mrb[4].mxu1 %vm485_vm1, %v2500_v7  ;;  %v2953_v7 = vld [vmem:[%s2882_s21 + $0x20] ss:$8 sps:$4 sm:$0xff]  }
  0x61   : > { %2337 = vmatprep.mubr.msk.bf16.mxu1 %vm485_vm1, %v2501_v8  ;;  %v2956_v8 = vld [vmem:[%s2882_s21 + $0x34] ss:$8 sps:$4 sm:$0xff]  }
  0x68   : > { %2338 = vmatmul.mubr.msk.bf16.gmra.mrb[8].mxu1 %vm485_vm1, %v2502_v9  ;;  %v2961_v9 = vld [vmem:[%s2882_s21 + $0x30] ss:$8 sps:$4 sm:$0xff]  }
  0x69   : > { %2341 = vmatprep.mubr.msk.bf16.mxu1 %vm485_vm1, %v2505_v10  ;;  %v2964_v10 = vld [vmem:[%s2882_s21 + $0x44] ss:$8 sps:$4 sm:$0xff]  }
  0x70   : > { %2342 = vmatmul.mubr.msk.bf16.gmra.mrb[12].mxu1 %vm485_vm1, %v2506_v11  ;;  %v2969_v11 = vld [vmem:[%s2882_s21 + $0x40] ss:$8 sps:$4 sm:$0xff]  }
  0x71   : > { %2345 = vmatprep.mubr.msk.bf16.mxu1 %vm485_vm1, %v2507_v12  ;;  %v2972_v12 = vld [vmem:[%s2882_s21 + $0x54] ss:$8 sps:$4 sm:$0xff]  }
  0x78   : > { %2346 = vmatmul.mubr.msk.bf16.gmra.mrb[16].mxu1 %vm485_vm1, %v2508_v13  ;;  %v2977_v13 = vld [vmem:[%s2882_s21 + $0x50] ss:$8 sps:$4 sm:$0xff]  }
  0x79   : > { %2349 = vmatprep.mubr.msk.bf16.mxu1 %vm485_vm1, %v2509_v14  ;;  %v2980_v14 = vld [vmem:[%s2882_s21 + $0x64] ss:$8 sps:$4 sm:$0xff]  }
  0x80   : > { %2350 = vmatmul.mubr.msk.bf16.gmra.mrb[20].mxu1 %vm485_vm1, %v2510_v15  ;;  %v2985_v15 = vld [vmem:[%s2882_s21 + $0x60] ss:$8 sps:$4 sm:$0xff]  }
  0x81   : > { %2353 = vmatprep.mubr.msk.bf16.mxu1 %vm485_vm1, %v2511_v16  ;;  %v2988_v16 = vld [vmem:[%s2882_s21 + $0x74] ss:$8 sps:$4 sm:$0xff]  }
  0x88   : > { %2354 = vmatmul.mubr.msk.bf16.gmra.mrb[24].mxu1 %vm485_vm1, %v2512_v17  ;;  %v2993_v17 = vld [vmem:[%s2882_s21 + $0x70] ss:$8 sps:$4 sm:$0xff]  }
  0x89   : > { %911 = vmatprep.mubr.bf16.mxu1 %v2933_v18 }
 0x12b   : > { %v2331_v19 = vpop.f32.mrb[0].mxu1 }
 0x12c   : > { %v588_v20 = vpop.f32.mrb[1].mxu1  ;;  %v2327_v25 = vpop.f32.mrb[0].mxu0 }
 0x12d   : > { %v2332_v21 = vpop.f32.mrb[2].mxu1  ;;  %v572_v26 = vpop.f32.mrb[1].mxu0 }
 0x12e   : > { %v702_v22 = vpack.c.bf16 %v2332_v21, %v2331_v19  ;;  %v591_v23 = vpop.f32.mrb[3].mxu1  ;;  %v2328_v27 = vpop.f32.mrb[2].mxu0  ;;  %v2996_v19 = vld [vmem:[%s2882_s21 + $0x84] ss:$8 sps:$4 sm:$0xff]   ;;  %v3004_v21 = vld [vmem:[%s2882_s21 + $0x94] ss:$8 sps:$4 sm:$0xff]  }
 0x12f   : > { %v701_v24 = vpack.c.bf16 %v591_v23, %v588_v20  ;;  %v700_v29 = vpack.c.bf16 %v2328_v27, %v2327_v25  ;;  %v575_v30 = vpop.f32.mrb[3].mxu0  ;;  %v3001_v20 = vld [vmem:[%s2882_s21 + $0x80] ss:$8 sps:$4 sm:$0xff]   ;;  %v3012_v23 = vld [vmem:[%s2882_s21 + $0xa4] ss:$8 sps:$4 sm:$0xff]  }
 0x130   : > { %v699_v32 = vpack.c.bf16 %v575_v30, %v572_v26  ;;  %v3020_v25 = vld [vmem:[%s2882_s21 + $0xb4] ss:$8 sps:$4 sm:$0xff]   ;;  %v3025_v26 = vld [vmem:[%s2882_s21 + $0xb0] ss:$8 sps:$4 sm:$0xff]   ;;  %v3028_v27 = vld [vmem:[%s2882_s21 + $0xc4] ss:$8 sps:$4 sm:$0xff]  }
 0x131   : > { %v2561_v30 = vld [vmem:[%s3324_s4] sm:$0xff]  }
 0x132   : > { %2357 = vmatprep.subr.bf16.mxu0 %v2561_v30 }
 0x133   : > { %v2335_v28 = vpop.f32.mrb[4].mxu1  ;;  %2358 = vmatpush3.bf16.msra.mxu0 %v2561_v30 }
 0x134   : > { %v604_v31 = vpop.f32.mrb[5].mxu1 }
 0x135   : > { %v2336_v33 = vpop.f32.mrb[6].mxu1 }
 0x136   : > { %v704_v34 = vpack.c.bf16 %v2336_v33, %v2335_v28  ;;  %v607_v35 = vpop.f32.mrb[7].mxu1  ;;  %v3033_v28 = vld [vmem:[%s2882_s21 + $0xc0] ss:$8 sps:$4 sm:$0xff]  }
 0x137   : > { %v703_v36 = vpack.c.bf16 %v607_v35, %v604_v31  ;;  %v3044_v31 = vld [vmem:[%s2882_s21 + $0xd0] ss:$8 sps:$4 sm:$0xff]   ;;  %v3052_v33 = vld [vmem:[%s2882_s21 + $0xe0] ss:$8 sps:$4 sm:$0xff]  }
 0x138   : > { %v3060_v35 = vld [vmem:[%s2882_s21 + $0xf0] ss:$8 sps:$4 sm:$0xff]  }
 0x13b   : > { %v2339_v37 = vpop.f32.mrb[8].mxu1 }
 0x13c   : > { %v620_v38 = vpop.f32.mrb[9].mxu1 }
 0x13d   : > { %v2340_v39 = vpop.f32.mrb[10].mxu1 }
 0x13e   : > { %v706_v40 = vpack.c.bf16 %v2340_v39, %v2339_v37  ;;  %v623_v41 = vpop.f32.mrb[11].mxu1  ;;  %v3066_v37 = vld [vmem:[%s3327_s7] ss:$0 sm:$0xff] }
 0x13f   : > { %v705_v42 = vpack.c.bf16 %v623_v41, %v620_v38 }
 0x143   : > { %v2343_v43 = vpop.f32.mrb[12].mxu1 }
 0x144   : > { %v636_v44 = vpop.f32.mrb[13].mxu1 }
 0x145   : > { %v2344_v45 = vpop.f32.mrb[14].mxu1 }
 0x146   : > { %v708_v46 = vpack.c.bf16 %v2344_v45, %v2343_v43  ;;  %v639_v47 = vpop.f32.mrb[15].mxu1 }
 0x147   : > { %v707_v48 = vpack.c.bf16 %v639_v47, %v636_v44 }
 0x149   : > { %2074 = vmatprep.subr.bf16.mxu1 %v707_v48 }
 0x14a   : > { %2075 = vmatpush3.bf16.msra.mxu1 %v699_v32  ;;  %v3047_v32 = vld [vmem:[%s2882_s21 + $0xe4] ss:$8 sps:$4 sm:$0xff]  }
 0x14b   : > { %v2347_v49 = vpop.f32.mrb[16].mxu1  ;;  %2076 = vmatprep.subr.bf16.mxu1 %v708_v46 }
 0x14c   : > { %v652_v50 = vpop.f32.mrb[17].mxu1 }
 0x14d   : > { %v2348_v51 = vpop.f32.mrb[18].mxu1 }
 0x14e   : > { %v710_v52 = vpack.c.bf16 %v2348_v51, %v2347_v49  ;;  %v655_v53 = vpop.f32.mrb[19].mxu1  ;;  %2077 = vmatpush3.bf16.msra.mxu1 %v700_v29  ;;  %v3036_v29 = vld [vmem:[%s2882_s21 + $0xd4] ss:$8 sps:$4 sm:$0xff]  }
 0x14f   : > { %v709_v54 = vpack.c.bf16 %v655_v53, %v652_v50 }
 0x151   : > { %2078 = vmatprep.subr.bf16.mxu1 %v709_v54 }
 0x152   : > { %2079 = vmatpush3.bf16.msra.mxu1 %v701_v24  ;;  %v3017_v24 = vld [vmem:[%s2882_s21 + $0xa0] ss:$8 sps:$4 sm:$0xff]  }
 0x153   : > { %v2351_v55 = vpop.f32.mrb[20].mxu1  ;;  %2080 = vmatprep.subr.bf16.mxu1 %v710_v52 }
 0x154   : > { %v668_v56 = vpop.f32.mrb[21].mxu1 }
 0x155   : > { %v2352_v57 = vpop.f32.mrb[22].mxu1 }
 0x156   : > { %v712_v58 = vpack.c.bf16 %v2352_v57, %v2351_v55  ;;  %v671_v59 = vpop.f32.mrb[23].mxu1  ;;  %2081 = vmatpush3.bf16.msra.mxu1 %v702_v22  ;;  %v3009_v22 = vld [vmem:[%s2882_s21 + $0x90] ss:$8 sps:$4 sm:$0xff]  }
 0x157   : > { %v711_v60 = vpack.c.bf16 %v671_v59, %v668_v56 }
 0x159   : > { %2082 = vmatprep.subr.bf16.mxu1 %v711_v60 }
 0x15a   : > { %2083 = vmatpush3.bf16.msra.mxu1 %v703_v36 }
 0x15b   : > { %v2355_v61 = vpop.f32.mrb[24].mxu1  ;;  %2084 = vmatprep.subr.bf16.mxu1 %v712_v58 }
 0x15c   : > { %v684_v62 = vpop.f32.mrb[25].mxu1 }
 0x15d   : > { %v2356_v63 = vpop.f32.mrb[26].mxu1 }
 0x15e   : > { %v714_v0 = vpack.c.bf16 %v2356_v63, %v2355_v61  ;;  %v687_v1 = vpop.f32.mrb[27].mxu1  ;;  %2085 = vmatpush3.bf16.msra.mxu1 %v704_v34  ;;  %v3055_v34 = vld [vmem:[%s2882_s21 + $0xf4] ss:$8 sps:$4 sm:$0xff]   ;;  %s2045_s21 = sshll.u32 %s2789_s16, 1  ;;  %s2706_s16 = smov [#allocation7]  }
 0x15f   : > { %v713_v2 = vpack.c.bf16 %v687_v1, %v684_v62  ;;  %s1600_s17 = sadd.s32 1, %s2045_s21  ;;  %s1596_s20 = sld [smem:[#allocation3 + %s2045_s21]] }
 0x160   : > { %s1601_s14 = sld [smem:[#allocation3 + %s1600_s17]]  ;;  %s3268_s17 = scalar_lea.hbm %s3328_s8, %s2053_s26 }
 0x161   : > { %2086 = vmatprep.subr.bf16.mxu1 %v713_v2  ;;  %s2608_s25 = sshll.u32 %s2706_s16, 4  ;;  %s2609_s25 = int_to_ptr.vmem [resolvable:$false] %s2608_s25 }
 0x162   : > { %2087 = vmatpush3.bf16.msra.mxu1 %v705_v42  ;;  %s2610_s30 = scalar_lea.vmem %s2609_s25, 256  ;;  %p2611_p5 = scmp.lt.s32.totalorder %s3270_s19, %s2609_s25 }
 0x163   : > { %2088 = vmatprep.subr.bf16.mxu1 %v714_v0 }
 0x166   : > { %2089 = vmatpush3.bf16.msra.mxu1 %v706_v40 }
 0x169   : > { %912 = vmatmul.mubr.bf16.vlgmr.msra.gmra.mrb[28].mxu1 %v2937_v3 }
 0x16a   : > { %919 = vmatprep.mubr.bf16.mxu1 %v2940_v4 }
 0x171   : > { %920 = vmatmul.mubr.bf16.gmra.mrb[32].mxu1 %v2945_v5 }
 0x172   : > { %927 = vmatprep.mubr.bf16.mxu1 %v2948_v6 }
 0x179   : > { %928 = vmatmul.mubr.bf16.gmra.mrb[36].mxu1 %v2953_v7 }
 0x17a   : > { %935 = vmatprep.mubr.bf16.mxu1 %v2956_v8 }
 0x181   : > { %936 = vmatmul.mubr.bf16.gmra.mrb[40].mxu1 %v2961_v9 }
 0x182   : > { %943 = vmatprep.mubr.bf16.mxu1 %v2964_v10 }
 0x189   : > { %944 = vmatmul.mubr.bf16.gmra.mrb[44].mxu1 %v2969_v11 }
 0x18a   : > { %951 = vmatprep.mubr.bf16.mxu1 %v2972_v12 }
 0x191   : > { %952 = vmatmul.mubr.bf16.gmra.mrb[48].mxu1 %v2977_v13 }
 0x192   : > { %959 = vmatprep.mubr.bf16.mxu1 %v2980_v14 }
 0x199   : > { %960 = vmatmul.mubr.bf16.gmra.mrb[52].mxu1 %v2985_v15 }
 0x19a   : > { %967 = vmatprep.mubr.bf16.mxu1 %v2988_v16 }
 0x1a1   : > { %968 = vmatmul.mubr.bf16.gmra.mrb[56].mxu1 %v2993_v17 }
 0x1a2   : > { %975 = vmatprep.mubr.bf16.mxu1 %v2996_v19 }
 0x1a9   : > { %976 = vmatmul.mubr.bf16.gmra.mrb[60].mxu1 %v3001_v20 }
 0x1aa   : > { %983 = vmatprep.mubr.bf16.mxu1 %v3004_v21 }
 0x1b1   : > { %984 = vmatmul.mubr.bf16.gmra.mrb[64].mxu1 %v3009_v22 }
 0x1b2   : > { %991 = vmatprep.mubr.bf16.mxu1 %v3012_v23 }
 0x1b9   : > { %992 = vmatmul.mubr.bf16.gmra.mrb[68].mxu1 %v3017_v24 }
 0x1ba   : > { %999 = vmatprep.mubr.bf16.mxu1 %v3020_v25 }
 0x1c1   : > { %1000 = vmatmul.mubr.bf16.gmra.mrb[72].mxu1 %v3025_v26 }
 0x1c2   : > { %1007 = vmatprep.mubr.bf16.mxu1 %v3028_v27 }
 0x1c9   : > { %1008 = vmatmul.mubr.bf16.gmra.mrb[76].mxu1 %v3033_v28 }
 0x1ca   : > { %1015 = vmatprep.mubr.bf16.mxu1 %v3036_v29 }
 0x1d1   : > { %1016 = vmatmul.mubr.bf16.gmra.mrb[80].mxu1 %v3044_v31 }
 0x1d2   : > { %1023 = vmatprep.mubr.bf16.mxu1 %v3047_v32 }
 0x1d9   : > { %1024 = vmatmul.mubr.bf16.gmra.mrb[84].mxu1 %v3052_v33 }
 0x1da   : > { %1031 = vmatprep.mubr.bf16.mxu1 %v3055_v34 }
 0x1e1   : > { %1032 = vmatmul.mubr.bf16.gmra.mrb[88].mxu1 %v3060_v35 }
 0x23c   : > { %v2090_v36 = vpop.f32.mrb[28].mxu1 }
 0x23d   : > { %v2091_v38 = vpop.f32.mrb[29].mxu1 }
 0x23e   : > { %v2092_v39 = vadd.f32 %v2091_v38, %v2090_v36  ;;  %v2093_v40 = vpop.f32.mrb[30].mxu1 }
 0x23f   : > { %v2094_v41 = vpop.f32.mrb[31].mxu1 }
 0x240   : > { %v914_v42 = vadd.f32 %v2092_v39, %v3066_v37  ;;  %v2095_v43 = vadd.f32 %v2094_v41, %v2093_v40 }
 0x242   : > { %v917_v44 = vadd.f32 %v2095_v43, %v3066_v37  ;;  %v1040_v45 = vmax.f32 %v914_v42, 0.0 }
 0x244   : > { %v1041_v46 = vmax.f32 %v917_v44, 0.0  ;;  %v2096_v47 = vpop.f32.mrb[32].mxu1 }
 0x245   : > { %v2097_v48 = vpop.f32.mrb[33].mxu1 }
 0x246   : > { %v1072_v49 = vpack.c.bf16 %v1041_v46, %v1040_v45  ;;  %v2098_v50 = vadd.f32 %v2097_v48, %v2096_v47  ;;  %v2099_v51 = vpop.f32.mrb[34].mxu1 }
 0x247   : > { %v2100_v52 = vpop.f32.mrb[35].mxu1 }
 0x248   : > { %v922_v53 = vadd.f32 %v2098_v50, %v3066_v37  ;;  %v2101_v54 = vadd.f32 %v2100_v52, %v2099_v51  ;;  %2359 = vmatprep.mubr.msk.bf16.mxu0 %vm1096_vm2, %v1072_v49 }
 0x24a   : > { %v925_v55 = vadd.f32 %v2101_v54, %v3066_v37  ;;  %v1042_v56 = vmax.f32 %v922_v53, 0.0 }
 0x24c   : > { %v1043_v57 = vmax.f32 %v925_v55, 0.0  ;;  %v2102_v58 = vpop.f32.mrb[36].mxu1 }
 0x24d   : > { %v2103_v59 = vpop.f32.mrb[37].mxu1 }
 0x24e   : > { %v1073_v60 = vpack.c.bf16 %v1043_v57, %v1042_v56  ;;  %v2104_v61 = vadd.f32 %v2103_v59, %v2102_v58  ;;  %v2105_v62 = vpop.f32.mrb[38].mxu1 }
 0x24f   : > { %v2106_v63 = vpop.f32.mrb[39].mxu1 }
 0x250   : > { %v930_v0 = vadd.f32 %v2104_v61, %v3066_v37  ;;  %2360 = vmatmul.mubr.msk.bf16.vlgmr.msra.gmra.mrb[4].mxu0 %vm1096_vm2, %v1073_v60  ;;  %v2107_v1 = vadd.f32 %v2106_v63, %v2105_v62 }
 0x252   : > { %v933_v2 = vadd.f32 %v2107_v1, %v3066_v37  ;;  %v1044_v30 = vmax.f32 %v930_v0, 0.0 }
 0x254   : > { %v1045_v36 = vmax.f32 %v933_v2, 0.0  ;;  %v2108_v38 = vpop.f32.mrb[40].mxu1 }
 0x255   : > { %v2109_v39 = vpop.f32.mrb[41].mxu1 }
 0x256   : > { %v1074_v40 = vpack.c.bf16 %v1045_v36, %v1044_v30  ;;  %v2110_v41 = vadd.f32 %v2109_v39, %v2108_v38  ;;  %v2111_v42 = vpop.f32.mrb[42].mxu1 }
 0x257   : > { %v2112_v43 = vpop.f32.mrb[43].mxu1 }
 0x258   : > { %v938_v44 = vadd.f32 %v2110_v41, %v3066_v37  ;;  %v2113_v45 = vadd.f32 %v2112_v43, %v2111_v42  ;;  %2363 = vmatprep.mubr.msk.bf16.mxu0 %vm1096_vm2, %v1074_v40 }
 0x25a   : > { %v941_v46 = vadd.f32 %v2113_v45, %v3066_v37  ;;  %v1046_v47 = vmax.f32 %v938_v44, 0.0 }
 0x25c   : > { %v1047_v48 = vmax.f32 %v941_v46, 0.0  ;;  %v2114_v49 = vpop.f32.mrb[44].mxu1 }
 0x25d   : > { %v2115_v50 = vpop.f32.mrb[45].mxu1 }
 0x25e   : > { %v1075_v51 = vpack.c.bf16 %v1047_v48, %v1046_v47  ;;  %v2116_v52 = vadd.f32 %v2115_v50, %v2114_v49  ;;  %v2117_v53 = vpop.f32.mrb[46].mxu1 }
 0x25f   : > { %v2118_v54 = vpop.f32.mrb[47].mxu1 }
 0x260   : > { %v946_v55 = vadd.f32 %v2116_v52, %v3066_v37  ;;  %2364 = vmatmul.mubr.msk.bf16.gmra.mrb[8].mxu0 %vm1096_vm2, %v1075_v51  ;;  %v2119_v56 = vadd.f32 %v2118_v54, %v2117_v53 }
 0x262   : > { %v949_v57 = vadd.f32 %v2119_v56, %v3066_v37  ;;  %v1048_v58 = vmax.f32 %v946_v55, 0.0 }
 0x264   : > { %v1049_v59 = vmax.f32 %v949_v57, 0.0  ;;  %v2120_v60 = vpop.f32.mrb[48].mxu1 }
 0x265   : > { %v2121_v61 = vpop.f32.mrb[49].mxu1 }
 0x266   : > { %v1076_v62 = vpack.c.bf16 %v1049_v59, %v1048_v58  ;;  %v2122_v63 = vadd.f32 %v2121_v61, %v2120_v60  ;;  %v2123_v0 = vpop.f32.mrb[50].mxu1 }
 0x267   : > { %v2124_v1 = vpop.f32.mrb[51].mxu1 }
 0x268   : > { %v954_v2 = vadd.f32 %v2122_v63, %v3066_v37  ;;  %v2125_v30 = vadd.f32 %v2124_v1, %v2123_v0  ;;  %2367 = vmatprep.mubr.msk.bf16.mxu0 %vm1096_vm2, %v1076_v62 }
 0x26a   : > { %v957_v36 = vadd.f32 %v2125_v30, %v3066_v37  ;;  %v1050_v38 = vmax.f32 %v954_v2, 0.0 }
 0x26c   : > { %v1051_v39 = vmax.f32 %v957_v36, 0.0  ;;  %v2126_v40 = vpop.f32.mrb[52].mxu1 }
 0x26d   : > { %v2127_v41 = vpop.f32.mrb[53].mxu1 }
 0x26e   : > { %v1077_v42 = vpack.c.bf16 %v1051_v39, %v1050_v38  ;;  %v2128_v43 = vadd.f32 %v2127_v41, %v2126_v40  ;;  %v2129_v44 = vpop.f32.mrb[54].mxu1 }
 0x26f   : > { %v2130_v45 = vpop.f32.mrb[55].mxu1 }
 0x270   : > { %v962_v46 = vadd.f32 %v2128_v43, %v3066_v37  ;;  %2368 = vmatmul.mubr.msk.bf16.gmra.mrb[12].mxu0 %vm1096_vm2, %v1077_v42  ;;  %v2131_v47 = vadd.f32 %v2130_v45, %v2129_v44 }
 0x272   : > { %v965_v48 = vadd.f32 %v2131_v47, %v3066_v37  ;;  %v1052_v49 = vmax.f32 %v962_v46, 0.0 }
 0x274   : > { %v1053_v50 = vmax.f32 %v965_v48, 0.0  ;;  %v2132_v51 = vpop.f32.mrb[56].mxu1 }
 0x275   : > { %v2133_v52 = vpop.f32.mrb[57].mxu1 }
 0x276   : > { %v1078_v53 = vpack.c.bf16 %v1053_v50, %v1052_v49  ;;  %v2134_v54 = vadd.f32 %v2133_v52, %v2132_v51  ;;  %v2135_v55 = vpop.f32.mrb[58].mxu1 }
 0x277   : > { %v2136_v56 = vpop.f32.mrb[59].mxu1 }
 0x278   : > { %v970_v57 = vadd.f32 %v2134_v54, %v3066_v37  ;;  %v2137_v58 = vadd.f32 %v2136_v56, %v2135_v55  ;;  %2371 = vmatprep.mubr.msk.bf16.mxu0 %vm1096_vm2, %v1078_v53 }
 0x27a   : > { %v973_v59 = vadd.f32 %v2137_v58, %v3066_v37  ;;  %v1054_v60 = vmax.f32 %v970_v57, 0.0 }
 0x27c   : > { %v1055_v61 = vmax.f32 %v973_v59, 0.0  ;;  %v2138_v62 = vpop.f32.mrb[60].mxu1 }
 0x27d   : > { %v2139_v63 = vpop.f32.mrb[61].mxu1 }
 0x27e   : > { %v1079_v0 = vpack.c.bf16 %v1055_v61, %v1054_v60  ;;  %v2140_v1 = vadd.f32 %v2139_v63, %v2138_v62  ;;  %v2141_v2 = vpop.f32.mrb[62].mxu1 }
 0x27f   : > { %v2142_v30 = vpop.f32.mrb[63].mxu1 }
 0x280   : > { %v978_v36 = vadd.f32 %v2140_v1, %v3066_v37  ;;  %v2143_v38 = vadd.f32 %v2142_v30, %v2141_v2  ;;  %2372 = vmatmul.mubr.msk.bf16.gmra.mrb[16].mxu0 %vm1096_vm2, %v1079_v0 }
 0x282   : > { %v981_v39 = vadd.f32 %v2143_v38, %v3066_v37  ;;  %v1056_v40 = vmax.f32 %v978_v36, 0.0 }
 0x284   : > { %v1057_v41 = vmax.f32 %v981_v39, 0.0  ;;  %v2144_v42 = vpop.f32.mrb[64].mxu1 }
 0x285   : > { %v2145_v43 = vpop.f32.mrb[65].mxu1 }
 0x286   : > { %v1080_v44 = vpack.c.bf16 %v1057_v41, %v1056_v40  ;;  %v2146_v45 = vadd.f32 %v2145_v43, %v2144_v42  ;;  %v2147_v46 = vpop.f32.mrb[66].mxu1 }
 0x287   : > { %v2148_v47 = vpop.f32.mrb[67].mxu1 }
 0x288   : > { %v986_v48 = vadd.f32 %v2146_v45, %v3066_v37  ;;  %v2149_v49 = vadd.f32 %v2148_v47, %v2147_v46  ;;  %2375 = vmatprep.mubr.msk.bf16.mxu0 %vm1096_vm2, %v1080_v44 }
 0x28a   : > { %v989_v50 = vadd.f32 %v2149_v49, %v3066_v37  ;;  %v1058_v51 = vmax.f32 %v986_v48, 0.0 }
 0x28c   : > { %v1059_v52 = vmax.f32 %v989_v50, 0.0  ;;  %v2150_v53 = vpop.f32.mrb[68].mxu1 }
 0x28d   : > { %v2151_v54 = vpop.f32.mrb[69].mxu1 }
 0x28e   : > { %v1081_v55 = vpack.c.bf16 %v1059_v52, %v1058_v51  ;;  %v2152_v56 = vadd.f32 %v2151_v54, %v2150_v53  ;;  %v2153_v57 = vpop.f32.mrb[70].mxu1 }
 0x28f   : > { %v2154_v58 = vpop.f32.mrb[71].mxu1 }
 0x290   : > { %2376 = vmatmul.mubr.msk.bf16.gmra.mrb[20].mxu0 %vm1096_vm2, %v1081_v55  ;;  %v994_v59 = vadd.f32 %v2152_v56, %v3066_v37  ;;  %v2155_v60 = vadd.f32 %v2154_v58, %v2153_v57 }
 0x292   : > { %v997_v61 = vadd.f32 %v2155_v60, %v3066_v37  ;;  %v1060_v62 = vmax.f32 %v994_v59, 0.0 }
 0x294   : > { %v1061_v63 = vmax.f32 %v997_v61, 0.0  ;;  %v2156_v0 = vpop.f32.mrb[72].mxu1 }
 0x295   : > { %v2157_v1 = vpop.f32.mrb[73].mxu1 }
 0x296   : > { %v1082_v2 = vpack.c.bf16 %v1061_v63, %v1060_v62  ;;  %v2158_v30 = vadd.f32 %v2157_v1, %v2156_v0  ;;  %v2159_v36 = vpop.f32.mrb[74].mxu1 }
 0x297   : > { %v2160_v38 = vpop.f32.mrb[75].mxu1 }
 0x298   : > { %v1002_v39 = vadd.f32 %v2158_v30, %v3066_v37  ;;  %v2161_v40 = vadd.f32 %v2160_v38, %v2159_v36  ;;  %2379 = vmatprep.mubr.msk.bf16.mxu0 %vm1096_vm2, %v1082_v2 }
 0x29a   : > { %v1005_v41 = vadd.f32 %v2161_v40, %v3066_v37  ;;  %v1062_v42 = vmax.f32 %v1002_v39, 0.0 }
 0x29c   : > { %v1063_v43 = vmax.f32 %v1005_v41, 0.0  ;;  %v2162_v44 = vpop.f32.mrb[76].mxu1 }
 0x29d   : > { %v2163_v45 = vpop.f32.mrb[77].mxu1 }
 0x29e   : > { %v1083_v46 = vpack.c.bf16 %v1063_v43, %v1062_v42  ;;  %v2164_v47 = vadd.f32 %v2163_v45, %v2162_v44  ;;  %v2165_v48 = vpop.f32.mrb[78].mxu1 }
 0x29f   : > { %v2166_v49 = vpop.f32.mrb[79].mxu1 }
 0x2a0   : > { %2380 = vmatmul.mubr.msk.bf16.gmra.mrb[24].mxu0 %vm1096_vm2, %v1083_v46  ;;  %v1010_v50 = vadd.f32 %v2164_v47, %v3066_v37  ;;  %v2167_v51 = vadd.f32 %v2166_v49, %v2165_v48 }
 0x2a2   : > { %v1013_v52 = vadd.f32 %v2167_v51, %v3066_v37  ;;  %v1064_v53 = vmax.f32 %v1010_v50, 0.0 }
 0x2a4   : > { %v1065_v54 = vmax.f32 %v1013_v52, 0.0  ;;  %v2168_v55 = vpop.f32.mrb[80].mxu1 }
 0x2a5   : > { %v2169_v56 = vpop.f32.mrb[81].mxu1 }
 0x2a6   : > { %v1084_v57 = vpack.c.bf16 %v1065_v54, %v1064_v53  ;;  %v2170_v58 = vadd.f32 %v2169_v56, %v2168_v55  ;;  %v2171_v59 = vpop.f32.mrb[82].mxu1 }
 0x2a7   : > { %v2172_v60 = vpop.f32.mrb[83].mxu1 }
 0x2a8   : > { %v1018_v61 = vadd.f32 %v2170_v58, %v3066_v37  ;;  %v2173_v62 = vadd.f32 %v2172_v60, %v2171_v59  ;;  %2383 = vmatprep.mubr.msk.bf16.mxu0 %vm1096_vm2, %v1084_v57 }
 0x2aa   : > { %v1021_v63 = vadd.f32 %v2173_v62, %v3066_v37  ;;  %v1066_v0 = vmax.f32 %v1018_v61, 0.0 }
 0x2ac   : > { %v1067_v1 = vmax.f32 %v1021_v63, 0.0  ;;  %v2174_v2 = vpop.f32.mrb[84].mxu1 }
 0x2ad   : > { %v2175_v30 = vpop.f32.mrb[85].mxu1 }
 0x2ae   : > { %v1085_v36 = vpack.c.bf16 %v1067_v1, %v1066_v0  ;;  %v2176_v38 = vadd.f32 %v2175_v30, %v2174_v2  ;;  %v2177_v39 = vpop.f32.mrb[86].mxu1 }
 0x2af   : > { %v2178_v40 = vpop.f32.mrb[87].mxu1 }
 0x2b0   : > { %2384 = vmatmul.mubr.msk.bf16.gmra.mrb[28].mxu0 %vm1096_vm2, %v1085_v36  ;;  %v1026_v41 = vadd.f32 %v2176_v38, %v3066_v37  ;;  %v2179_v42 = vadd.f32 %v2178_v40, %v2177_v39 }
 0x2b2   : > { %v1029_v43 = vadd.f32 %v2179_v42, %v3066_v37  ;;  %v1068_v44 = vmax.f32 %v1026_v41, 0.0 }
 0x2b4   : > { %v1069_v45 = vmax.f32 %v1029_v43, 0.0  ;;  %v2180_v46 = vpop.f32.mrb[88].mxu1 }
 0x2b5   : > { %v2181_v47 = vpop.f32.mrb[89].mxu1 }
 0x2b6   : > { %v1086_v48 = vpack.c.bf16 %v1069_v45, %v1068_v44  ;;  %v2182_v49 = vadd.f32 %v2181_v47, %v2180_v46  ;;  %v2183_v50 = vpop.f32.mrb[90].mxu1 }
 0x2b7   : > { %v2184_v51 = vpop.f32.mrb[91].mxu1 }
 0x2b8   : > { %v1034_v52 = vadd.f32 %v2182_v49, %v3066_v37  ;;  %v2185_v53 = vadd.f32 %v2184_v51, %v2183_v50  ;;  %2387 = vmatprep.mubr.msk.bf16.mxu0 %vm1096_vm2, %v1086_v48 }
 0x2ba   : > { %v1037_v54 = vadd.f32 %v2185_v53, %v3066_v37  ;;  %v1070_v55 = vmax.f32 %v1034_v52, 0.0 }
 0x2bc   : > { %v1071_v56 = vmax.f32 %v1037_v54, 0.0 }
 0x2be   : > { %v1087_v57 = vpack.c.bf16 %v1071_v56, %v1070_v55 }
 0x2c0   : > { %2388 = vmatmul.mubr.msk.bf16.gmra.mrb[32].mxu0 %vm1096_vm2, %v1087_v57 }
 0x2c1   : > { %1358 = vmatprep.mubr.bf16.mxu0 %v2933_v18 }
 0x323   : > { %v2361_v58 = vpop.f32.mrb[4].mxu0 }
 0x324   : > { %v1179_v59 = vpop.f32.mrb[5].mxu0 }
 0x325   : > { %v2362_v60 = vpop.f32.mrb[6].mxu0 }
 0x326   : > { %v1307_v61 = vpack.c.bf16 %v2362_v60, %v2361_v58  ;;  %v1182_v62 = vpop.f32.mrb[7].mxu0 }
 0x327   : > { %v1306_v63 = vpack.c.bf16 %v1182_v62, %v1179_v59 }
 0x333   : > { %v2365_v0 = vpop.f32.mrb[8].mxu0 }
 0x334   : > { %v1195_v1 = vpop.f32.mrb[9].mxu0 }
 0x335   : > { %v2366_v2 = vpop.f32.mrb[10].mxu0 }
 0x336   : > { %v1309_v30 = vpack.c.bf16 %v2366_v2, %v2365_v0  ;;  %v1198_v36 = vpop.f32.mrb[11].mxu0 }
 0x337   : > { %v1308_v38 = vpack.c.bf16 %v1198_v36, %v1195_v1 }
 0x343   : > { %v2369_v37 = vpop.f32.mrb[12].mxu0 }
 0x344   : > { %v1211_v39 = vpop.f32.mrb[13].mxu0 }
 0x345   : > { %v2370_v40 = vpop.f32.mrb[14].mxu0 }
 0x346   : > { %v1311_v41 = vpack.c.bf16 %v2370_v40, %v2369_v37  ;;  %v1214_v42 = vpop.f32.mrb[15].mxu0 }
 0x347   : > { %v1310_v43 = vpack.c.bf16 %v1214_v42, %v1211_v39 }
 0x353   : > { %v2373_v44 = vpop.f32.mrb[16].mxu0 }
 0x354   : > { %v1227_v18 = vpop.f32.mrb[17].mxu0 }
 0x355   : > { %v2374_v45 = vpop.f32.mrb[18].mxu0 }
 0x356   : > { %v1313_v46 = vpack.c.bf16 %v2374_v45, %v2373_v44  ;;  %v1230_v47 = vpop.f32.mrb[19].mxu0 }
 0x357   : > { %v1312_v48 = vpack.c.bf16 %v1230_v47, %v1227_v18 }
 0x363   : > { %v2377_v49 = vpop.f32.mrb[20].mxu0 }
 0x364   : > { %v1243_v50 = vpop.f32.mrb[21].mxu0 }
 0x365   : > { %v2378_v51 = vpop.f32.mrb[22].mxu0 }
 0x366   : > { %v1315_v52 = vpack.c.bf16 %v2378_v51, %v2377_v49  ;;  %v1246_v53 = vpop.f32.mrb[23].mxu0 }
 0x367   : > { %v1314_v54 = vpack.c.bf16 %v1246_v53, %v1243_v50 }
 0x369   : > { %2203 = vmatprep.subr.bf16.mxu0 %v1314_v54 }
 0x36a   : > { %2204 = vmatpush3.bf16.msra.mxu0 %v1306_v63 }
 0x36b   : > { %2205 = vmatprep.subr.bf16.mxu0 %v1315_v52 }
 0x36e   : > { %2206 = vmatpush3.bf16.msra.mxu0 %v1307_v61 }
 0x373   : > { %v2381_v55 = vpop.f32.mrb[24].mxu0 }
 0x374   : > { %v1259_v56 = vpop.f32.mrb[25].mxu0 }
 0x375   : > { %v2382_v57 = vpop.f32.mrb[26].mxu0 }
 0x376   : > { %v1317_v58 = vpack.c.bf16 %v2382_v57, %v2381_v55  ;;  %v1262_v59 = vpop.f32.mrb[27].mxu0 }
 0x377   : > { %v1316_v60 = vpack.c.bf16 %v1262_v59, %v1259_v56 }
 0x379   : > { %2207 = vmatprep.subr.bf16.mxu0 %v1316_v60 }
 0x37a   : > { %2208 = vmatpush3.bf16.msra.mxu0 %v1308_v38 }
 0x37b   : > { %2209 = vmatprep.subr.bf16.mxu0 %v1317_v58 }
 0x37e   : > { %2210 = vmatpush3.bf16.msra.mxu0 %v1309_v30 }
 0x383   : > { %v2385_v62 = vpop.f32.mrb[28].mxu0 }
 0x384   : > { %v1275_v0 = vpop.f32.mrb[29].mxu0 }
 0x385   : > { %v2386_v1 = vpop.f32.mrb[30].mxu0 }
 0x386   : > { %v1319_v2 = vpack.c.bf16 %v2386_v1, %v2385_v62  ;;  %v1278_v36 = vpop.f32.mrb[31].mxu0 }
 0x387   : > { %v1318_v37 = vpack.c.bf16 %v1278_v36, %v1275_v0 }
 0x389   : > { %2211 = vmatprep.subr.bf16.mxu0 %v1318_v37 }
 0x38a   : > { %2212 = vmatpush3.bf16.msra.mxu0 %v1310_v43 }
 0x38b   : > { %2213 = vmatprep.subr.bf16.mxu0 %v1319_v2 }
 0x38e   : > { %2214 = vmatpush3.bf16.msra.mxu0 %v1311_v41 }
 0x393   : > { %v2389_v61 = vpop.f32.mrb[32].mxu0 }
 0x394   : > { %v1291_v63 = vpop.f32.mrb[33].mxu0 }
 0x395   : > { %v2390_v39 = vpop.f32.mrb[34].mxu0 }
 0x396   : > { %v1321_v40 = vpack.c.bf16 %v2390_v39, %v2389_v61  ;;  %v1294_v42 = vpop.f32.mrb[35].mxu0 }
 0x397   : > { %v1320_v44 = vpack.c.bf16 %v1294_v42, %v1291_v63 }
 0x399   : > { %2215 = vmatprep.subr.bf16.mxu0 %v1320_v44 }
 0x39a   : > { %2216 = vmatpush3.bf16.msra.mxu0 %v1312_v48 }
 0x39b   : > { %2217 = vmatprep.subr.bf16.mxu0 %v1321_v40 }
 0x39e   : > { %2218 = vmatpush3.bf16.msra.mxu0 %v1313_v46 }
 0x3a1   : > { %1359 = vmatmul.mubr.bf16.vlgmr.msra.gmra.mrb[36].mxu0 %v2937_v3  ;;  %v1613_v3 = vld [vmem:[%s3325_s5 + $0x10] sm:$0xf] }
 0x3a2   : > { %1366 = vmatprep.mubr.bf16.mxu0 %v2940_v4  ;;  %v2703_v4 = vmov 0.0  }
 0x3a3   : > { %2391 = vmatprep.subr.mxu1 %v2703_v4  ;;  %2393 = vmatprep.mubr.msk.f32.mxu1 %vm2704_vm5, %v2703_v4 }
 0x3a4   : > { %2392 = vmatpush3.msk.msra.mxu1 %vm1617_vm3, %v1613_v3 }
 0x3a9   : > { %1367 = vmatmul.mubr.bf16.gmra.mrb[40].mxu0 %v2945_v5 }
 0x3aa   : > { %1374 = vmatprep.mubr.bf16.mxu0 %v2948_v6 }
 0x3b1   : > { %1375 = vmatmul.mubr.bf16.gmra.mrb[44].mxu0 %v2953_v7 }
 0x3b2   : > { %1382 = vmatprep.mubr.bf16.mxu0 %v2956_v8 }
 0x3b9   : > { %1383 = vmatmul.mubr.bf16.gmra.mrb[48].mxu0 %v2961_v9 }
 0x3ba   : > { %1390 = vmatprep.mubr.bf16.mxu0 %v2964_v10 }
 0x3c1   : > { %1391 = vmatmul.mubr.bf16.gmra.mrb[52].mxu0 %v2969_v11 }
 0x3c2   : > { %1398 = vmatprep.mubr.bf16.mxu0 %v2972_v12 }
 0x3c9   : > { %1399 = vmatmul.mubr.bf16.gmra.mrb[56].mxu0 %v2977_v13  ;;  %v339_v13 = vld [vmem:[%s3327_s7 + $0x5] sm:$0x1] }
 0x3ca   : > { %1406 = vmatprep.mubr.bf16.mxu0 %v2980_v14  ;;  %v1602_v14 = vstv %s1601_s14  ;;  %s1851_s14 = scalar_lea.sflag [#allocation6], %s322_s24 }
 0x3d1   : > { %1407 = vmatmul.mubr.bf16.gmra.mrb[60].mxu0 %v2985_v15 }
 0x3d2   : > { %1414 = vmatprep.mubr.bf16.mxu0 %v2988_v16 }
 0x3d9   : > { %1415 = vmatmul.mubr.bf16.gmra.mrb[64].mxu0 %v2993_v17  ;;  %v1603_v17 = vmul.f32 %v1602_v14, %v339_v13 }
 0x3da   : > { %1422 = vmatprep.mubr.bf16.mxu0 %v2996_v19 }
 0x3e1   : > { %1423 = vmatmul.mubr.bf16.gmra.mrb[68].mxu0 %v3001_v20  ;;  %v336_v20 = vld [vmem:[%s3327_s7 + $0x2] sm:$0x1] }
 0x3e2   : > { %1430 = vmatprep.mubr.bf16.mxu0 %v3004_v21  ;;  %v1597_v21 = vstv %s1596_s20  ;;  %s2604_s20 = scalar_lea.vmem %s3270_s19, 128 }
 0x3e3   : > { %p2605_p11 = scmp.ne.s32.totalorder %s3270_s19, %s2604_s20  ;;  %p2612_p10 = scmp.lt.s32.totalorder %s2610_s30, %s2604_s20 }
 0x3e5   : > { %p2606_p7 = pnand %p2605_p11, %p3340_p6  ;;  %p2613_p12 = por %p2612_p10, %p2611_p5 }
 0x3e7   : > { %p2607_p13 = pneg %p2606_p7 }
 0x3e9   : > { %1431 = vmatmul.mubr.bf16.gmra.mrb[72].mxu0 %v3009_v22  ;;  %v3162_v22 = vld [vmem:[%s3327_s7 + $0x1] ss:$0 sm:$0xff]  ;;  %p2614_p0 = pnand %p2613_p12, %p2607_p13 }
 0x3ea   : > { %1438 = vmatprep.mubr.bf16.mxu0 %v3012_v23 }
 0x3f1   : > { %1439 = vmatmul.mubr.bf16.gmra.mrb[76].mxu0 %v3017_v24  ;;  %v1598_v24 = vmul.f32 %v1597_v21, %v339_v13 }
 0x3f2   : > { %1446 = vmatprep.mubr.bf16.mxu0 %v3020_v25  ;;  %v1604_v25 = vadd.f32 %v1603_v17, %v336_v20 }
 0x3f9   : > { %1447 = vmatmul.mubr.bf16.gmra.mrb[80].mxu0 %v3025_v26  ;;  %v1611_v26 = vld [vmem:[%s3325_s5] sm:$0xff] }
 0x3fa   : > { %1454 = vmatprep.mubr.bf16.mxu0 %v3028_v27  ;;  %v1612_v27 = vld [vmem:[%s3325_s5 + $0x8] sm:$0xff] }
 0x401   : > { %1455 = vmatmul.mubr.bf16.gmra.mrb[84].mxu0 %v3033_v28  ;;  %v1599_v28 = vadd.f32 %v1598_v24, %v336_v20 }
 0x402   : > { %1462 = vmatprep.mubr.bf16.mxu0 %v3036_v29  ;;  %v1606_v29 = vrot.slane %v1604_v25, 7 }
 0x409   : > { %1463 = vmatmul.mubr.bf16.gmra.mrb[88].mxu0 %v3044_v31  ;;  %v2705_v31 = vmov 0.0|0.0  }
 0x40a   : > { %1470 = vmatprep.mubr.bf16.mxu0 %v3047_v32  ;;  %2410 = vmatprep.subr.bf16.mxu1 %v2705_v31  ;;  %v2411_v32 = vpack.c.bf16 %v1612_v27, %v1611_v26 }
 0x411   : > { %1471 = vmatmul.mubr.bf16.gmra.mrb[92].mxu0 %v3052_v33 }
 0x412   : > { %1478 = vmatprep.mubr.bf16.mxu0 %v3055_v34 }
 0x419   : > { %1479 = vmatmul.mubr.bf16.gmra.mrb[96].mxu0 %v3060_v35  ;;  %v1608_v35 = vsel %vm1593_vm4, %v1599_v28, %v1606_v29 }
 0x41a   : > { %v1610_v38 = vsel %vm534_vm0, %v1608_v35, 0.0 }
 0x41b   : > { %2394 = vmatmul.mubr.msk.f32.vlgmr.msra.gmra.mrb[92].mxu1 %vm485_vm1, %v1610_v38 }
 0x41c   : > { %2412 = vmatpush3.bf16.msra.mxu1 %v2411_v32  ;;  %2400 = vmatprep.mubr.msk.f32.mxu1 %vm2704_vm5, %v2703_v4 }
 0x41d   : > { %2413 = vmatprep.subr.bf16.mxu1 %v2705_v31 }
 0x474   : > { %v2219_v5 = vpop.f32.mrb[36].mxu0 }
 0x475   : > { %v2220_v6 = vpop.f32.mrb[37].mxu0 }
 0x476   : > { %v2221_v7 = vadd.f32 %v2220_v6, %v2219_v5  ;;  %v2222_v8 = vpop.f32.mrb[38].mxu0 }
 0x477   : > { %v2223_v9 = vpop.f32.mrb[39].mxu0 }
 0x478   : > { %v2224_v10 = vadd.f32 %v2223_v9, %v2222_v8  ;;  %v1361_v33 = vadd.f32 %v2221_v7, %v3162_v22 }
 0x47a   : > { %v1364_v41 = vadd.f32 %v2224_v10, %v3162_v22  ;;  %v1487_v46 = vmax.f32 %v1361_v33, 0.0 }
 0x47c   : > { %v2225_v11 = vpop.f32.mrb[40].mxu0  ;;  %v1488_v49 = vmax.f32 %v1364_v41, 0.0  ;;  %v1519_v52 = vsel %vm1096_vm2, %v1487_v46, -inf }
 0x47d   : > { %v2226_v12 = vpop.f32.mrb[41].mxu0 }
 0x47e   : > { %v2227_v15 = vadd.f32 %v2226_v12, %v2225_v11  ;;  %v2228_v16 = vpop.f32.mrb[42].mxu0  ;;  %v1520_v59 = vsel %vm1096_vm2, %v1488_v49, -inf }
 0x47f   : > { %v2229_v19 = vpop.f32.mrb[43].mxu0 }
 0x480   : > { %v2230_v23 = vadd.f32 %v2229_v19, %v2228_v16  ;;  %v1369_v53 = vadd.f32 %v2227_v15, %v3162_v22 }
 0x482   : > { %v1372_v60 = vadd.f32 %v2230_v23, %v3162_v22  ;;  %v1489_v37 = vmax.f32 %v1369_v53, 0.0 }
 0x484   : > { %v2231_v34 = vpop.f32.mrb[44].mxu0  ;;  %v1490_v39 = vmax.f32 %v1372_v60, 0.0  ;;  %v1521_v44 = vsel %vm1096_vm2, %v1489_v37, -inf }
 0x485   : > { %v2232_v30 = vpop.f32.mrb[45].mxu0 }
 0x486   : > { %v2233_v43 = vadd.f32 %v2232_v30, %v2231_v34  ;;  %v2234_v18 = vpop.f32.mrb[46].mxu0  ;;  %v1522_v9 = vsel %vm1096_vm2, %v1490_v39, -inf }
 0x487   : > { %v2235_v45 = vpop.f32.mrb[47].mxu0 }
 0x488   : > { %v1377_v47 = vadd.f32 %v2233_v43, %v3162_v22  ;;  %v2236_v48 = vadd.f32 %v2235_v45, %v2234_v18 }
 0x48a   : > { %v1491_v50 = vmax.f32 %v1377_v47, 0.0  ;;  %v1380_v51 = vadd.f32 %v2236_v48, %v3162_v22 }
 0x48c   : > { %v1523_v54 = vsel %vm1096_vm2, %v1491_v50, -inf  ;;  %v1492_v55 = vmax.f32 %v1380_v51, 0.0  ;;  %v2237_v56 = vpop.f32.mrb[48].mxu0 }
 0x48d   : > { %v1524_v57 = vmax.f32 %v1519_v52, %v1523_v54  ;;  %v2238_v58 = vpop.f32.mrb[49].mxu0 }
 0x48e   : > { %v1525_v62 = vsel %vm1096_vm2, %v1492_v55, -inf  ;;  %v2239_v0 = vadd.f32 %v2238_v58, %v2237_v56  ;;  %v2240_v1 = vpop.f32.mrb[50].mxu0 }
 0x48f   : > { %v1526_v2 = vmax.f32 %v1520_v59, %v1525_v62  ;;  %v2241_v36 = vpop.f32.mrb[51].mxu0 }
 0x490   : > { %v1385_v61 = vadd.f32 %v2239_v0, %v3162_v22  ;;  %v2242_v63 = vadd.f32 %v2241_v36, %v2240_v1 }
 0x492   : > { %v1493_v40 = vmax.f32 %v1385_v61, 0.0  ;;  %v1388_v42 = vadd.f32 %v2242_v63, %v3162_v22 }
 0x494   : > { %v1527_v3 = vsel %vm1096_vm2, %v1493_v40, -inf  ;;  %v1494_v5 = vmax.f32 %v1388_v42, 0.0  ;;  %v2243_v6 = vpop.f32.mrb[52].mxu0 }
 0x495   : > { %v1528_v7 = vmax.f32 %v1521_v44, %v1527_v3  ;;  %v2244_v8 = vpop.f32.mrb[53].mxu0 }
 0x496   : > { %v1529_v10 = vsel %vm1096_vm2, %v1494_v5, -inf  ;;  %v2245_v11 = vadd.f32 %v2244_v8, %v2243_v6  ;;  %v2246_v12 = vpop.f32.mrb[54].mxu0 }
 0x497   : > { %v1530_v13 = vmax.f32 %v1522_v9, %v1529_v10  ;;  %v2247_v14 = vpop.f32.mrb[55].mxu0 }
 0x498   : > { %v1393_v15 = vadd.f32 %v2245_v11, %v3162_v22  ;;  %v2248_v16 = vadd.f32 %v2247_v14, %v2246_v12 }
 0x49a   : > { %v1495_v17 = vmax.f32 %v1393_v15, 0.0  ;;  %v1396_v19 = vadd.f32 %v2248_v16, %v3162_v22 }
 0x49c   : > { %v1531_v20 = vsel %vm1096_vm2, %v1495_v17, -inf  ;;  %v1496_v21 = vmax.f32 %v1396_v19, 0.0  ;;  %v2249_v23 = vpop.f32.mrb[56].mxu0 }
 0x49d   : > { %v1532_v24 = vmax.f32 %v1524_v57, %v1531_v20  ;;  %v2250_v25 = vpop.f32.mrb[57].mxu0 }
 0x49e   : > { %v1533_v26 = vsel %vm1096_vm2, %v1496_v21, -inf  ;;  %v2251_v27 = vadd.f32 %v2250_v25, %v2249_v23  ;;  %v2252_v28 = vpop.f32.mrb[58].mxu0 }
 0x49f   : > { %v1534_v29 = vmax.f32 %v1526_v2, %v1533_v26  ;;  %v2253_v31 = vpop.f32.mrb[59].mxu0 }
 0x4a0   : > { %v1401_v32 = vadd.f32 %v2251_v27, %v3162_v22  ;;  %v2254_v33 = vadd.f32 %v2253_v31, %v2252_v28 }
 0x4a2   : > { %v1497_v34 = vmax.f32 %v1401_v32, 0.0  ;;  %v1404_v35 = vadd.f32 %v2254_v33, %v3162_v22 }
 0x4a4   : > { %v1535_v30 = vsel %vm1096_vm2, %v1497_v34, -inf  ;;  %v1498_v38 = vmax.f32 %v1404_v35, 0.0  ;;  %v2255_v41 = vpop.f32.mrb[60].mxu0 }
 0x4a5   : > { %v1536_v43 = vmax.f32 %v1528_v7, %v1535_v30  ;;  %v2256_v18 = vpop.f32.mrb[61].mxu0 }
 0x4a6   : > { %v1537_v45 = vsel %vm1096_vm2, %v1498_v38, -inf  ;;  %v2257_v46 = vadd.f32 %v2256_v18, %v2255_v41  ;;  %v2258_v47 = vpop.f32.mrb[62].mxu0 }
 0x4a7   : > { %v1538_v48 = vmax.f32 %v1530_v13, %v1537_v45  ;;  %v2259_v49 = vpop.f32.mrb[63].mxu0 }
 0x4a8   : > { %v1409_v50 = vadd.f32 %v2257_v46, %v3162_v22  ;;  %v2260_v51 = vadd.f32 %v2259_v49, %v2258_v47 }
 0x4aa   : > { %v1499_v52 = vmax.f32 %v1409_v50, 0.0  ;;  %v1412_v53 = vadd.f32 %v2260_v51, %v3162_v22 }
 0x4ac   : > { %v1539_v54 = vsel %vm1096_vm2, %v1499_v52, -inf  ;;  %v1500_v55 = vmax.f32 %v1412_v53, 0.0  ;;  %v2261_v56 = vpop.f32.mrb[64].mxu0 }
 0x4ad   : > { %v1540_v57 = vmax.f32 %v1532_v24, %v1539_v54  ;;  %v2262_v58 = vpop.f32.mrb[65].mxu0 }
 0x4ae   : > { %v1541_v59 = vsel %vm1096_vm2, %v1500_v55, -inf  ;;  %v2263_v60 = vadd.f32 %v2262_v58, %v2261_v56  ;;  %v2264_v62 = vpop.f32.mrb[66].mxu0 }
 0x4af   : > { %v1542_v0 = vmax.f32 %v1534_v29, %v1541_v59  ;;  %v2265_v1 = vpop.f32.mrb[67].mxu0 }
 0x4b0   : > { %v1417_v2 = vadd.f32 %v2263_v60, %v3162_v22  ;;  %v2266_v36 = vadd.f32 %v2265_v1, %v2264_v62 }
 0x4b1   : > { %v1547_v37 = vmax.f32 %v1540_v57, %v1542_v0 }
 0x4b2   : > { %v1501_v61 = vmax.f32 %v1417_v2, 0.0  ;;  %v1420_v63 = vadd.f32 %v2266_v36, %v3162_v22 }
 0x4b4   : > { %v1543_v39 = vsel %vm1096_vm2, %v1501_v61, -inf  ;;  %v1502_v40 = vmax.f32 %v1420_v63, 0.0  ;;  %v2267_v42 = vpop.f32.mrb[68].mxu0 }
 0x4b5   : > { %v1544_v44 = vmax.f32 %v1536_v43, %v1543_v39  ;;  %v2268_v3 = vpop.f32.mrb[69].mxu0 }
 0x4b6   : > { %v1545_v5 = vsel %vm1096_vm2, %v1502_v40, -inf  ;;  %v2269_v6 = vadd.f32 %v2268_v3, %v2267_v42  ;;  %v2270_v7 = vpop.f32.mrb[70].mxu0 }
 0x4b7   : > { %v1546_v8 = vmax.f32 %v1538_v48, %v1545_v5  ;;  %v2271_v9 = vpop.f32.mrb[71].mxu0 }
 0x4b8   : > { %v2272_v10 = vadd.f32 %v2271_v9, %v2270_v7  ;;  %v1425_v20 = vadd.f32 %v2269_v6, %v3162_v22 }
 0x4b9   : > { %v1548_v11 = vmax.f32 %v1544_v44, %v1546_v8 }
 0x4ba   : > { %v1428_v24 = vadd.f32 %v2272_v10, %v3162_v22  ;;  %v1503_v28 = vmax.f32 %v1425_v20, 0.0 }
 0x4bb   : > { %v3209_v12 = vmax.f32 %v1547_v37, %v1548_v11 }
 0x4bc   : > { %v2273_v13 = vpop.f32.mrb[72].mxu0  ;;  %v1504_v32 = vmax.f32 %v1428_v24, 0.0  ;;  %v1556_v35 = vsel %vm1096_vm2, %v1503_v28, -inf }
 0x4bd   : > { %v2274_v14 = vpop.f32.mrb[73].mxu0 }
 0x4be   : > { %v2275_v15 = vadd.f32 %v2274_v14, %v2273_v13  ;;  %v2276_v16 = vpop.f32.mrb[74].mxu0  ;;  %v1557_v46 = vsel %vm1096_vm2, %v1504_v32, -inf }
 0x4bf   : > { %v2277_v17 = vpop.f32.mrb[75].mxu0 }
 0x4c0   : > { %v2278_v19 = vadd.f32 %v2277_v17, %v2276_v16  ;;  %v1433_v30 = vadd.f32 %v2275_v15, %v3162_v22 }
 0x4c2   : > { %v1436_v47 = vadd.f32 %v2278_v19, %v3162_v22  ;;  %v1505_v53 = vmax.f32 %v1433_v30, 0.0 }
 0x4c4   : > { %v2279_v21 = vpop.f32.mrb[76].mxu0  ;;  %v1506_v56 = vmax.f32 %v1436_v47, 0.0  ;;  %v1558_v59 = vsel %vm1096_vm2, %v1505_v53, -inf }
 0x4c5   : > { %v2280_v23 = vpop.f32.mrb[77].mxu0 }
 0x4c6   : > { %v2281_v25 = vadd.f32 %v2280_v23, %v2279_v21  ;;  %v2282_v26 = vpop.f32.mrb[78].mxu0  ;;  %v1559_v36 = vsel %vm1096_vm2, %v1506_v56, -inf }
 0x4c7   : > { %v2283_v27 = vpop.f32.mrb[79].mxu0 }
 0x4c8   : > { %v1441_v29 = vadd.f32 %v2281_v25, %v3162_v22  ;;  %v2284_v31 = vadd.f32 %v2283_v27, %v2282_v26 }
 0x4ca   : > { %v1507_v33 = vmax.f32 %v1441_v29, 0.0  ;;  %v1444_v34 = vadd.f32 %v2284_v31, %v3162_v22 }
 0x4cc   : > { %v1560_v38 = vsel %vm1096_vm2, %v1507_v33, -inf  ;;  %v1508_v41 = vmax.f32 %v1444_v34, 0.0  ;;  %v2285_v43 = vpop.f32.mrb[80].mxu0 }
 0x4cd   : > { %v1561_v18 = vmax.f32 %v1556_v35, %v1560_v38  ;;  %v2286_v45 = vpop.f32.mrb[81].mxu0 }
 0x4ce   : > { %v1562_v48 = vsel %vm1096_vm2, %v1508_v41, -inf  ;;  %v2287_v49 = vadd.f32 %v2286_v45, %v2285_v43  ;;  %v2288_v50 = vpop.f32.mrb[82].mxu0 }
 0x4cf   : > { %v1563_v51 = vmax.f32 %v1557_v46, %v1562_v48  ;;  %v2289_v52 = vpop.f32.mrb[83].mxu0 }
 0x4d0   : > { %v1449_v54 = vadd.f32 %v2287_v49, %v3162_v22  ;;  %v2290_v55 = vadd.f32 %v2289_v52, %v2288_v50 }
 0x4d2   : > { %v1509_v57 = vmax.f32 %v1449_v54, 0.0  ;;  %v1452_v58 = vadd.f32 %v2290_v55, %v3162_v22 }
 0x4d4   : > { %v1564_v60 = vsel %vm1096_vm2, %v1509_v57, -inf  ;;  %v1510_v62 = vmax.f32 %v1452_v58, 0.0  ;;  %v2291_v0 = vpop.f32.mrb[84].mxu0  ;;  %v1550_v57 = vrot.slane %v3209_v12, 4 }
 0x4d5   : > { %v1565_v1 = vmax.f32 %v1558_v59, %v1564_v60  ;;  %v2292_v2 = vpop.f32.mrb[85].mxu0 }
 0x4d6   : > { %v1566_v37 = vsel %vm1096_vm2, %v1510_v62, -inf  ;;  %v2293_v61 = vadd.f32 %v2292_v2, %v2291_v0  ;;  %v2294_v63 = vpop.f32.mrb[86].mxu0  ;;  %v1551_v0 = vmax.f32 %v3209_v12, %v1550_v57 }
 0x4d7   : > { %v1567_v39 = vmax.f32 %v1559_v36, %v1566_v37  ;;  %v2295_v40 = vpop.f32.mrb[87].mxu0 }
 0x4d8   : > { %v1457_v42 = vadd.f32 %v2293_v61, %v3162_v22  ;;  %v2296_v44 = vadd.f32 %v2295_v40, %v2294_v63  ;;  %v1552_v36 = vrot.slane %v1551_v0, 2 }
 0x4da   : > { %v1511_v3 = vmax.f32 %v1457_v42, 0.0  ;;  %v1460_v5 = vadd.f32 %v2296_v44, %v3162_v22 }
 0x4dc   : > { %v1568_v6 = vsel %vm1096_vm2, %v1511_v3, -inf  ;;  %v1512_v7 = vmax.f32 %v1460_v5, 0.0  ;;  %v2297_v8 = vpop.f32.mrb[88].mxu0 }
 0x4dd   : > { %v1569_v9 = vmax.f32 %v1561_v18, %v1568_v6  ;;  %v2298_v10 = vpop.f32.mrb[89].mxu0 }
 0x4de   : > { %v1570_v11 = vsel %vm1096_vm2, %v1512_v7, -inf  ;;  %v2299_v13 = vadd.f32 %v2298_v10, %v2297_v8  ;;  %v2300_v14 = vpop.f32.mrb[90].mxu0  ;;  %v1771_v10 = vld [vmem:[%s3326_s6 + $0x8] sm:$0xff] }
 0x4df   : > { %v1571_v15 = vmax.f32 %v1563_v51, %v1570_v11  ;;  %v2301_v16 = vpop.f32.mrb[91].mxu0 }
 0x4e0   : > { %v1465_v17 = vadd.f32 %v2299_v13, %v3162_v22  ;;  %v2302_v19 = vadd.f32 %v2301_v16, %v2300_v14  ;;  %v2049_v13 = vld [vmem:[%s3327_s7 + $0x3] ss:$0 sm:$0xff] }
 0x4e2   : > { %v1513_v20 = vmax.f32 %v1465_v17, 0.0  ;;  %v1468_v21 = vadd.f32 %v2302_v19, %v3162_v22  ;;  %v2050_v19 = vld [vmem:[%s3327_s7 + $0x4] ss:$0 sm:$0xff] }
 0x4e4   : > { %v1572_v23 = vsel %vm1096_vm2, %v1513_v20, -inf  ;;  %v1514_v24 = vmax.f32 %v1468_v21, 0.0  ;;  %v2303_v25 = vpop.f32.mrb[92].mxu0 }
 0x4e5   : > { %v1573_v26 = vmax.f32 %v1565_v1, %v1572_v23  ;;  %v2304_v27 = vpop.f32.mrb[93].mxu0 }
 0x4e6   : > { %v1574_v28 = vsel %vm1096_vm2, %v1514_v24, -inf  ;;  %v2305_v29 = vadd.f32 %v2304_v27, %v2303_v25  ;;  %v2306_v31 = vpop.f32.mrb[94].mxu0 }
 0x4e7   : > { %v1575_v32 = vmax.f32 %v1567_v39, %v1574_v28  ;;  %v2307_v33 = vpop.f32.mrb[95].mxu0  ;;  %v1553_v39 = vmax.f32 %v1551_v0, %v1552_v36 }
 0x4e8   : > { %v1473_v34 = vadd.f32 %v2305_v29, %v3162_v22  ;;  %v2308_v35 = vadd.f32 %v2307_v33, %v2306_v31 }
 0x4e9   : > { %v1554_v42 = vrot.slane %v1553_v39, 1 }
 0x4ea   : > { %v1515_v30 = vmax.f32 %v1473_v34, 0.0  ;;  %v1476_v38 = vadd.f32 %v2308_v35, %v3162_v22 }
 0x4eb   : > { %v1555_v3 = vmax.f32 %v1553_v39, %v1554_v42 }
 0x4ec   : > { %v1576_v41 = vsel %vm1096_vm2, %v1515_v30, -inf  ;;  %v1516_v43 = vmax.f32 %v1476_v38, 0.0  ;;  %v2309_v18 = vpop.f32.mrb[96].mxu0 }
 0x4ed   : > { %v1577_v45 = vmax.f32 %v1569_v9, %v1576_v41  ;;  %v2310_v46 = vpop.f32.mrb[97].mxu0  ;;  %v1770_v9 = vld [vmem:[%s3326_s6] sm:$0xff] }
 0x4ee   : > { %v1578_v47 = vsel %vm1096_vm2, %v1516_v43, -inf  ;;  %v2311_v48 = vadd.f32 %v2310_v46, %v2309_v18  ;;  %v2312_v49 = vpop.f32.mrb[98].mxu0  ;;  %v1687_v12 = vpop.f32.mrb[92].mxu1  ;;  %v2414_v11 = vpack.c.bf16 %v1771_v10, %v1770_v9 }
 0x4ef   : > { %v1579_v50 = vmax.f32 %v1571_v15, %v1578_v47  ;;  %v2313_v51 = vpop.f32.mrb[99].mxu0  ;;  %v2395_v8 = vpop.f32.mrb[93].mxu1 }
 0x4f0   : > { %v1481_v52 = vadd.f32 %v2311_v48, %v3162_v22  ;;  %v2314_v53 = vadd.f32 %v2313_v51, %v2312_v49 }
 0x4f1   : > { %v1584_v54 = vmax.f32 %v1577_v45, %v1579_v50 }
 0x4f2   : > { %v1517_v55 = vmax.f32 %v1481_v52, 0.0  ;;  %v1484_v56 = vadd.f32 %v2314_v53, %v3162_v22 }
 0x4f4   : > { %v1580_v58 = vsel %vm1096_vm2, %v1517_v55, -inf  ;;  %v1518_v59 = vmax.f32 %v1484_v56, 0.0 }
 0x4f5   : > { %v1581_v60 = vmax.f32 %v1573_v26, %v1580_v58 }
 0x4f6   : > { %v1582_v62 = vsel %vm1096_vm2, %v1518_v59, -inf }
 0x4f7   : > { %v1583_v1 = vmax.f32 %v1575_v32, %v1582_v62 }
 0x4f9   : > { %v1585_v2 = vmax.f32 %v1581_v60, %v1583_v1 }
 0x4fb   : > { %v1586_v37 = vmax.f32 %v1584_v54, %v1585_v2 }
 0x4fd   : > { %v1587_v61 = vrot.slane %v1586_v37, 4 }
 0x4ff   : > { %v1588_v63 = vmax.f32 %v1586_v37, %v1587_v61 }
 0x501   : > { %v1589_v40 = vrot.slane %v1588_v63, 2 }
 0x503   : > { %v1590_v22 = vmax.f32 %v1588_v63, %v1589_v40 }
 0x505   : > { %v1591_v44 = vrot.slane %v1590_v22, 1 }
 0x507   : > { %v1592_v5 = vmax.f32 %v1590_v22, %v1591_v44 }
 0x509   : > { %v1594_v6 = vsel %vm1593_vm4, %v1555_v3, %v1592_v5 }
 0x50a   : > { %v1609_v7 = vsel %vm534_vm0, %v1594_v6, 0.0 }
 0x50b   : > { %2401 = vmatmul.mubr.msk.f32.vlgmr.msra.gmra.mrb[94].mxu1 %vm1096_vm2, %v1609_v7 }
 0x50c   : > { %2407 = vmatprep.mubr.msk.f32.mxu1 %vm2704_vm5, %v2703_v4  ;;  %2415 = vmatpush3.bf16.msra.mxu1 %v2414_v11 }
 0x5de   : > { %v1760_v14 = vpop.f32.mrb[94].mxu1 }
 0x5df   : > { %v1761_v15 = vadd.f32 %v1760_v14, %v1687_v12  ;;  %v2402_v4 = vpop.f32.mrb[95].mxu1 }
 0x5e1   : > { %v1768_v16 = vadd.f32 %v2049_v13, %v1761_v15 }
 0x5e3   : > { %v1769_v17 = vmax.f32 %v1768_v16, 0.0 }
 0x5e5   : > { %2408 = vmatmul.mubr.msk.f32.vlgmr.msra.gmra.mrb[96].mxu1 %vm1096_vm2, %v1769_v17 }
 0x6b8   : > { %v1845_v20 = vpop.f32.mrb[96].mxu1 }
 0x6b9   : > { %v1846_v21 = vadd.f32 %v2050_v19, %v1845_v20  ;;  %v2409_v23 = vpop.f32.mrb[97].mxu1 }
 0x6bb   : > { %1849 = vst [vmem:[%s324_s12] sm:$0xff] %v1846_v21 }
 0x6bc   : > { %2617 = shalt.err (!%p2614_p0)
}
 0x6bd   : > { %s2618_s24 = scalar_lea.hbm %s3268_s17, 128  ;;  %s2622_s23 = scalar_lea.hbm %s3328_s8, 256 }
 0x6be   : > { %p2619_p1 = scmp.ne.s32.totalorder %s3268_s17, %s2618_s24  ;;  %p2623_p8 = scmp.lt.u32.totalorder %s3268_s17, %s3328_s8 }
 0x6bf   : > { %p2624_p9 = scmp.lt.u32.totalorder %s2622_s23, %s2618_s24  ;;  %p2626_p11 = scmp.lt.u32.totalorder %s2618_s24, %s3268_s17 }
 0x6c0   : > { %p2620_p2 = pnand %p2619_p1, %p3340_p6 }
 0x6c1   : > { %p2625_p4 = por %p2624_p9, %p2623_p8 }
 0x6c2   : > { %p2621_p3 = pneg %p2620_p2 }
 0x6c3   : > { %p2627_p7 = por %p2626_p11, %p2625_p4 }
 0x6c5   : > { %p2628_p13 = pnand %p2627_p7, %p2621_p3 }
 0x6c7   : > { %2631 = shalt.err (!%p2628_p13)
}
 0x6c8   : > { %2422 = dma.vmem_to_hbm [thread:$0]  (%p3340_p6), %s3270_s19, 128, %s3268_s17, %s1851_s14  }
 0x6c9 PF: > { %s1876_s29 = sand.u32 1, %s2672_s10   ;;  %p3341_p5 = scmp.ne.s32.totalorder %s3337_s28, 0 }
 0x6ca   : > { %p3342_p10 = scmp.ge.s32.totalorder %s2696_s15, 2  ;;  %s1877_s21 = scalar_lea.sflag [#allocation6], %s1876_s29 }
 0x6cc   : > { %p2429_p12 = pnand %p3342_p10, %p3341_p5 }
 0x6ce   : > { %2667 = dma.done.wait (!%p2429_p12), %s1877_s21, 128  }
 0x6cf   : > { %2669 = vsyncadd (!%p2429_p12), %s1877_s21, 4294967168  ;;  %s3343_s20 = sld [smem:[#allocation13_spill]]  ;;  %s3344_s27 = sld [smem:[#allocation11_spill]] }
 0x6d0   : > { %s3345_s14 = sld [smem:[#allocation12_spill]]  ;;  %p27_p6 = scmp.ge.s32.totalorder %s2793_s18, 4  }
 0x6d1   : > { %s3346_s10 = smov %s2676_s0  ;;  %s3347_s0 = smov %s2680_s11 }
 0x6d2   : > { %s3349_s12 = smov %s2688_s13  ;;  %s3351_s15 = smov %s2793_s18 }
 0x6d3   :  { %29 = sbr.rel (!%p27_p6) target bundleno = 22 (0x16), region = 96 }
 0x6d5   : > { %s3348_s11 = smov %s3343_s20  ;;  %s3350_s13 = smov %s3344_s27 }
 0x6da   :  { %1882 = vsyncpa [#allocation5], 1 }
 0x6db   :  { %1884 = vsyncpa [#allocation5 + $0x1], 1 }
 0x6dc   :  { %1885 = vsyncpa [#allocation6], 1 }
 0x6dd   :  { %1887 = vsyncpa [#allocation6 + $0x1], 1 }

</bundles_post_ra>
